<compile_context>
chip_gen: v7x
topology: tpu7x:2x2x1
jax: 0.10.0
libtpu: 0.0.40
codegen_flags: <defaults>
</compile_context>

<pallas_src>
import jax
import jax.numpy as jnp
from jax.experimental import pallas as pl
from jax.experimental.pallas import tpu as pltpu

N_LAYERS = 6
INPUT_DIM = 2
HID_DIM = 32
BATCH = 8

H2 = 2 * HID_DIM        # 64 : fused s|t hidden width
O2 = 2 * INPUT_DIM      # 4  : fused s|t output width
WROWS = H2 + 8          # 72 : packed [W2^T ; W3^T ; pad] sublane extent


def _mask_schedule():
    """Exactly the mask schedule RealNVP.__init__ builds for mask=[0,1], n_layers=6."""
    m = [0.0, 1.0]
    masks = [list(m)]
    for _ in range(N_LAYERS - 2):
        m = [1.0 - v for v in m]
        masks.append(list(m))
    masks.append([1.0 - v for v in m])
    return masks


MASKS = _mask_schedule()                       # [[0,1],[1,0],[0,1],[1,0],[0,1],[1,0]]
ACTIVE = [row.index(1.0) for row in MASKS]     # component kept by x*mask (identity path)


def realnvp_kernel(x_ref, w_ref, sp_ref, out_ref):
    # x_ref  : (2, TB)       batch on lanes
    # w_ref  : (6, 72, 64)   rows 0..63 = W2^T (block-diag), rows 64..67 = W3^T
    # sp_ref : (6, 64, 4)    cols: 0 = w1act, 1 = b1, 2 = b2, 3[:4] = b3
    # out_ref: (3, TB)       rows: y0, y1, ldj
    rows = [x_ref[0:1, :], x_ref[1:2, :]]          # the two (1, TB) components
    ldj = jnp.zeros_like(rows[0])                  # deferred log|det J| accumulator

    for l in range(N_LAYERS):                      # static unroll over coupling layers
        a = ACTIVE[l]                              # compile-time constants
        p = 1 - a

        w1a = sp_ref[l, :, 0:1]                    # (64, 1)
        b1 = sp_ref[l, :, 1:2]                     # (64, 1)
        b2 = sp_ref[l, :, 2:3]                     # (64, 1)
        b3 = sp_ref[l, 0:O2, 3:4]                  # (4, 1)
        w2t = w_ref[l, 0:H2, :]                    # (64, 64)
        w3t = w_ref[l, H2:H2 + O2, :]              # (4, 64)

        # Stage 1 (fused s|t): rank-1 VPU update -- only the active input row
        # survives x*mask, so (x*mask) @ W1 == x[active] * W1[active, :].
        h = jnp.maximum(w1a * rows[a] + b1, 0.0)   # (64, TB)

        # Stage 2 (fused, block-diagonal): one MXU dot, N = TB on lanes.
        h = jnp.maximum(
            jnp.dot(w2t, h, preferred_element_type=jnp.float32) + b2, 0.0)

        # Stage 3 (fused, block-diagonal): (4,64) @ (64,TB).
        o = jnp.dot(w3t, h, preferred_element_type=jnp.float32) + b3   # (4, TB)

        s = jnp.tanh(o[0:INPUT_DIM, :])            # (2, TB) full s_out
        s_p = s[p:p + 1, :]                        # passive-component s
        t_p = o[INPUT_DIM + p:INPUT_DIM + p + 1, :]

        # Affine coupling: one-hot mask -> active row passes through untouched.
        rows[p] = rows[p] * jnp.exp(s_p) + t_p
        # PyTorch reference sums ALL of s_out into the log-det term.
        ldj = ldj + s[0:1, :] + s[1:2, :]

    out_ref[0:1, :] = rows[0]
    out_ref[1:2, :] = rows[1]
    out_ref[2:3, :] = ldj


def _pick_tb(batch):
    """Lane-axis tile: full batch when small; otherwise a 128-multiple so the
    batch grid has >=2 'parallel' steps (keeps both v7x TensorCores busy)."""
    if batch >= 256 and batch % 128 == 0:
        for tb in (512, 256, 128):
            if batch % tb == 0 and batch // tb >= 2:
                return tb
    return batch


def realnvp_forward(x, fused):
    w_big, sp = fused
    B = x.shape[0]
    xt = jnp.transpose(x)                          # (2, B), batch on lanes
    TB = _pick_tb(B)
    assert B % TB == 0
    grid = (B // TB,)

    out = pl.pallas_call(
        realnvp_kernel,
        out_shape=jax.ShapeDtypeStruct((INPUT_DIM + 1, B), jnp.float32),
        grid=grid,
        in_specs=[
            pl.BlockSpec((INPUT_DIM, TB), lambda i: (0, i)),            # x^T (batch-tiled)
            pl.BlockSpec((N_LAYERS, WROWS, H2), lambda i: (0, 0, 0)),   # packed W2^T/W3^T (resident)
            pl.BlockSpec((N_LAYERS, H2, 4), lambda i: (0, 0, 0)),       # packed small params (resident)
        ],
        out_specs=pl.BlockSpec((INPUT_DIM + 1, TB), lambda i: (0, i)),  # merged lane-dense output
        compiler_params=pltpu.CompilerParams(
            dimension_semantics=("parallel",)),
    )(xt, w_big, sp)

    y = jnp.transpose(out[:INPUT_DIM, :])          # (B, 2)
    ldj = out[INPUT_DIM, :]                        # (B,)
    return y, ldj


def fuse_params(params):
    """Host-side fusion: s/t networks concatenated, block-diagonal, pre-transposed
    for the batch-on-lanes layout, and packed into two kernel operands."""
    (_, sw1, sb1, sw2, sb2, sw3, sb3, tw1, tb1, tw2, tb2, tw3, tb3) = params
    layer_idx = jnp.arange(N_LAYERS)
    act = jnp.asarray(ACTIVE)

    # Stage 1: only the active input row of each W1 ever contributes; concat s|t.
    w1act = jnp.concatenate([sw1[layer_idx, act], tw1[layer_idx, act]], axis=-1)  # (6, 64)
    b1 = jnp.concatenate([sb1, tb1], axis=-1)                                     # (6, 64)
    b2 = jnp.concatenate([sb2, tb2], axis=-1)                                     # (6, 64)
    b3 = jnp.concatenate([sb3, tb3], axis=-1)                                     # (6, 4)

    # Stage 2: block-diag([sw2, tw2]), transposed so the kernel computes W2^T @ h.
    z2 = jnp.zeros((N_LAYERS, HID_DIM, HID_DIM), jnp.float32)
    sw2t = jnp.swapaxes(sw2, 1, 2)
    tw2t = jnp.swapaxes(tw2, 1, 2)
    w2T = jnp.concatenate(
        [jnp.concatenate([sw2t, z2], axis=-1),
         jnp.concatenate([z2, tw2t], axis=-1)], axis=1)                           # (6, 64, 64)

    # Stage 3: block-diag([sw3, tw3]) transposed -> rows 0-1 = s, rows 2-3 = t.
    z3 = jnp.zeros((N_LAYERS, INPUT_DIM, HID_DIM), jnp.float32)
    sw3t = jnp.swapaxes(sw3, 1, 2)
    tw3t = jnp.swapaxes(tw3, 1, 2)
    w3T = jnp.concatenate(
        [jnp.concatenate([sw3t, z3], axis=-1),
         jnp.concatenate([z3, tw3t], axis=-1)], axis=1)                           # (6, 4, 64)

    # Packed big-weight operand: [W2^T ; W3^T ; pad to 72 sublanes].
    pad = jnp.zeros((N_LAYERS, WROWS - H2 - O2, H2), jnp.float32)
    w_big = jnp.concatenate([w2T, w3T, pad], axis=1)                              # (6, 72, 64)

    # Packed small-param operand: columns = [w1act | b1 | b2 | b3 (zero-padded)].
    b3col = jnp.zeros((N_LAYERS, H2), jnp.float32).at[:, :O2].set(b3)
    sp = jnp.stack([w1act, b1, b2, b3col], axis=-1)                               # (6, 64, 4)

    return w_big, sp


def ref_forward(x, params):
    """Pure-JAX reference matching the PyTorch forward semantics (unfused weights)."""
    (masks, sw1, sb1, sw2, sb2, sw3, sb3,
     tw1, tb1, tw2, tb2, tw3, tb3) = params
    ldj_sum = jnp.zeros((x.shape[0],), jnp.float32)
    for l in range(N_LAYERS):
        m = masks[l]
        xm = x * m
        h = jax.nn.relu(xm @ sw1[l] + sb1[l])
        h = jax.nn.relu(h @ sw2[l] + sb2[l])
        s = jnp.tanh(h @ sw3[l] + sb3[l])
        g = jax.nn.relu(xm @ tw1[l] + tb1[l])
        g = jax.nn.relu(g @ tw2[l] + tb2[l])
        t = g @ tw3[l] + tb3[l]
        x = xm + (1.0 - m) * (x * jnp.exp(s) + t)
        ldj_sum = ldj_sum + s.sum(axis=1)   # matches PyTorch: sums ALL of s_out
    return x, ldj_sum


def make_params(key):
    """Deterministic synthetic weights (PyTorch-Linear-like uniform init),
    stacked over the 6 layers, weights pre-transposed to (in, out)."""
    def lin(k, fan_in, fan_out):
        kw, kb = jax.random.split(k)
        bound = 1.0 / jnp.sqrt(fan_in)
        w = jax.random.uniform(kw, (N_LAYERS, fan_in, fan_out),
                               jnp.float32, -bound, bound)
        b = jax.random.uniform(kb, (N_LAYERS, fan_out),
                               jnp.float32, -bound, bound)
        return w, b

    ks = jax.random.split(key, 6)
    sw1, sb1 = lin(ks[0], INPUT_DIM, HID_DIM)
    sw2, sb2 = lin(ks[1], HID_DIM, HID_DIM)
    sw3, sb3 = lin(ks[2], HID_DIM, INPUT_DIM)
    tw1, tb1 = lin(ks[3], INPUT_DIM, HID_DIM)
    tw2, tb2 = lin(ks[4], HID_DIM, HID_DIM)
    tw3, tb3 = lin(ks[5], HID_DIM, INPUT_DIM)

    masks = jnp.asarray(MASKS, jnp.float32)   # (6, 2), same schedule baked in the kernel

    return (masks, sw1, sb1, sw2, sb2, sw3, sb3,
            tw1, tb1, tw2, tb2, tw3, tb3)


# TODO(synk): only forward() is implemented; RealNVP.backward (inverse pass) would be a
# separate kernel with the layers reversed and (y - t) * exp(-s) coupling.

if __name__ == "__main__":
    key = jax.random.PRNGKey(0)
    k_x, k_p = jax.random.split(key)
    x = jax.random.normal(k_x, (BATCH, INPUT_DIM), jnp.float32)
    params = make_params(k_p)
    fused = fuse_params(params)

    y, ldj = realnvp_forward(x, fused)
    jax.block_until_ready((y, ldj))

    y_ref, ldj_ref = ref_forward(x, params)
    assert jnp.allclose(y, y_ref, atol=1e-4, rtol=1e-4), float(jnp.max(jnp.abs(y - y_ref)))
    assert jnp.allclose(ldj, ldj_ref, atol=1e-4, rtol=1e-4), float(jnp.max(jnp.abs(ldj - ldj_ref)))

    print("KERNEL_OK")
</pallas_src>

<mosaic_0001>
module attributes {stable_mosaic.version = 11 : i64} {
  func.func @realnvp_kernel(%arg0: i32, %arg1: memref<2x8xf32, #tpu.memory_space<vmem>>, %arg2: memref<6x72x64xf32, #tpu.memory_space<vmem>>, %arg3: memref<6x64x4xf32, #tpu.memory_space<vmem>>, %arg4: memref<3x8xf32, #tpu.memory_space<vmem>>) attributes {dimension_semantics = [#tpu.dimension_semantics<parallel>], iteration_bounds = array<i64: 1>, scalar_prefetch = 0 : i64, scratch_operands = 0 : i64, tpu.core_type = #tpu.core_type<tc>, window_params = [{transform_indices = @transform_0, window_bounds = array<i64: 2, 8>}, {pipeline_mode = #tpu.pipeline_mode<synchronous>, transform_indices = @transform_1, window_bounds = array<i64: 6, 72, 64>}, {pipeline_mode = #tpu.pipeline_mode<synchronous>, transform_indices = @transform_2, window_bounds = array<i64: 6, 64, 4>}, {transform_indices = @transform_3, window_bounds = array<i64: 3, 8>}]} {
    %c0 = arith.constant 0 : index
    %c0_0 = arith.constant 0 : index
    %0 = vector.load %arg1[%c0, %c0_0] : memref<2x8xf32, #tpu.memory_space<vmem>>, vector<1x8xf32>
    %c1 = arith.constant 1 : index
    %c0_1 = arith.constant 0 : index
    %1 = vector.load %arg1[%c1, %c0_1] : memref<2x8xf32, #tpu.memory_space<vmem>>, vector<1x8xf32>
    %cst = arith.constant 0.000000e+00 : f32
    %2 = vector.broadcast %cst : f32 to vector<1x8xf32>
    %c0_2 = arith.constant 0 : index
    %c0_3 = arith.constant 0 : index
    %c0_4 = arith.constant 0 : index
    %3 = vector.load %arg3[%c0_2, %c0_3, %c0_4] : memref<6x64x4xf32, #tpu.memory_space<vmem>>, vector<1x64x1xf32>
    %4 = vector.shape_cast %3 : vector<1x64x1xf32> to vector<64x1xf32>
    %c0_5 = arith.constant 0 : index
    %c0_6 = arith.constant 0 : index
    %c1_7 = arith.constant 1 : index
    %5 = vector.load %arg3[%c0_5, %c0_6, %c1_7] : memref<6x64x4xf32, #tpu.memory_space<vmem>>, vector<1x64x1xf32>
    %6 = vector.shape_cast %5 : vector<1x64x1xf32> to vector<64x1xf32>
    %c0_8 = arith.constant 0 : index
    %c0_9 = arith.constant 0 : index
    %c2 = arith.constant 2 : index
    %7 = vector.load %arg3[%c0_8, %c0_9, %c2] : memref<6x64x4xf32, #tpu.memory_space<vmem>>, vector<1x64x1xf32>
    %8 = vector.shape_cast %7 : vector<1x64x1xf32> to vector<64x1xf32>
    %c0_10 = arith.constant 0 : index
    %c0_11 = arith.constant 0 : index
    %c3 = arith.constant 3 : index
    %9 = vector.load %arg3[%c0_10, %c0_11, %c3] : memref<6x64x4xf32, #tpu.memory_space<vmem>>, vector<1x4x1xf32>
    %10 = vector.shape_cast %9 : vector<1x4x1xf32> to vector<4x1xf32>
    %c0_12 = arith.constant 0 : index
    %c0_13 = arith.constant 0 : index
    %c0_14 = arith.constant 0 : index
    %11 = vector.load %arg2[%c0_12, %c0_13, %c0_14] : memref<6x72x64xf32, #tpu.memory_space<vmem>>, vector<1x64x64xf32>
    %12 = vector.shape_cast %11 : vector<1x64x64xf32> to vector<64x64xf32>
    %c0_15 = arith.constant 0 : index
    %c64 = arith.constant 64 : index
    %c0_16 = arith.constant 0 : index
    %13 = vector.load %arg2[%c0_15, %c64, %c0_16] : memref<6x72x64xf32, #tpu.memory_space<vmem>>, vector<1x4x64xf32>
    %14 = vector.shape_cast %13 : vector<1x4x64xf32> to vector<4x64xf32>
    %15 = vector.broadcast %4 : vector<64x1xf32> to vector<64x8xf32>
    %16 = vector.broadcast %1 : vector<1x8xf32> to vector<64x8xf32>
    %17 = arith.mulf %15, %16 : vector<64x8xf32>
    %18 = vector.broadcast %6 : vector<64x1xf32> to vector<64x8xf32>
    %19 = arith.addf %17, %18 : vector<64x8xf32>
    %cst_17 = arith.constant 0.000000e+00 : f32
    %20 = vector.broadcast %cst_17 : f32 to vector<64x8xf32>
    %21 = arith.maximumf %19, %20 : vector<64x8xf32>
    %cst_18 = arith.constant dense<0.000000e+00> : vector<64x8xf32>
    %22 = tpu.matmul %12, %21, %cst_18 {dimension_numbers = #tpu.dot_dimension_numbers<[1], [0], [0], [1], [0, 0, 1, 1], [], []>} : vector<64x64xf32>, vector<64x8xf32>, vector<64x8xf32> -> vector<64x8xf32>
    %23 = vector.broadcast %8 : vector<64x1xf32> to vector<64x8xf32>
    %24 = arith.addf %22, %23 : vector<64x8xf32>
    %cst_19 = arith.constant 0.000000e+00 : f32
    %25 = vector.broadcast %cst_19 : f32 to vector<64x8xf32>
    %26 = arith.maximumf %24, %25 : vector<64x8xf32>
    %cst_20 = arith.constant dense<0.000000e+00> : vector<4x8xf32>
    %27 = tpu.matmul %14, %26, %cst_20 {dimension_numbers = #tpu.dot_dimension_numbers<[1], [0], [0], [1], [0, 0, 1, 1], [], []>} : vector<4x64xf32>, vector<64x8xf32>, vector<4x8xf32> -> vector<4x8xf32>
    %28 = vector.broadcast %10 : vector<4x1xf32> to vector<4x8xf32>
    %29 = arith.addf %27, %28 : vector<4x8xf32>
    %30 = vector.extract_strided_slice %29 {offsets = [0, 0], sizes = [2, 8], strides = [1, 1]} : vector<4x8xf32> to vector<2x8xf32>
    %31 = math.tanh %30 : vector<2x8xf32>
    %32 = vector.extract_strided_slice %31 {offsets = [0, 0], sizes = [1, 8], strides = [1, 1]} : vector<2x8xf32> to vector<1x8xf32>
    %33 = vector.extract_strided_slice %29 {offsets = [2, 0], sizes = [1, 8], strides = [1, 1]} : vector<4x8xf32> to vector<1x8xf32>
    %34 = math.exp %32 : vector<1x8xf32>
    %35 = arith.mulf %0, %34 : vector<1x8xf32>
    %36 = arith.addf %35, %33 : vector<1x8xf32>
    %37 = vector.extract_strided_slice %31 {offsets = [0, 0], sizes = [1, 8], strides = [1, 1]} : vector<2x8xf32> to vector<1x8xf32>
    %38 = arith.addf %2, %37 : vector<1x8xf32>
    %39 = vector.extract_strided_slice %31 {offsets = [1, 0], sizes = [1, 8], strides = [1, 1]} : vector<2x8xf32> to vector<1x8xf32>
    %40 = arith.addf %38, %39 : vector<1x8xf32>
    %c1_21 = arith.constant 1 : index
    %c0_22 = arith.constant 0 : index
    %c0_23 = arith.constant 0 : index
    %41 = vector.load %arg3[%c1_21, %c0_22, %c0_23] : memref<6x64x4xf32, #tpu.memory_space<vmem>>, vector<1x64x1xf32>
    %42 = vector.shape_cast %41 : vector<1x64x1xf32> to vector<64x1xf32>
    %c1_24 = arith.constant 1 : index
    %c0_25 = arith.constant 0 : index
    %c1_26 = arith.constant 1 : index
    %43 = vector.load %arg3[%c1_24, %c0_25, %c1_26] : memref<6x64x4xf32, #tpu.memory_space<vmem>>, vector<1x64x1xf32>
    %44 = vector.shape_cast %43 : vector<1x64x1xf32> to vector<64x1xf32>
    %c1_27 = arith.constant 1 : index
    %c0_28 = arith.constant 0 : index
    %c2_29 = arith.constant 2 : index
    %45 = vector.load %arg3[%c1_27, %c0_28, %c2_29] : memref<6x64x4xf32, #tpu.memory_space<vmem>>, vector<1x64x1xf32>
    %46 = vector.shape_cast %45 : vector<1x64x1xf32> to vector<64x1xf32>
    %c1_30 = arith.constant 1 : index
    %c0_31 = arith.constant 0 : index
    %c3_32 = arith.constant 3 : index
    %47 = vector.load %arg3[%c1_30, %c0_31, %c3_32] : memref<6x64x4xf32, #tpu.memory_space<vmem>>, vector<1x4x1xf32>
    %48 = vector.shape_cast %47 : vector<1x4x1xf32> to vector<4x1xf32>
    %c1_33 = arith.constant 1 : index
    %c0_34 = arith.constant 0 : index
    %c0_35 = arith.constant 0 : index
    %49 = vector.load %arg2[%c1_33, %c0_34, %c0_35] : memref<6x72x64xf32, #tpu.memory_space<vmem>>, vector<1x64x64xf32>
    %50 = vector.shape_cast %49 : vector<1x64x64xf32> to vector<64x64xf32>
    %c1_36 = arith.constant 1 : index
    %c64_37 = arith.constant 64 : index
    %c0_38 = arith.constant 0 : index
    %51 = vector.load %arg2[%c1_36, %c64_37, %c0_38] : memref<6x72x64xf32, #tpu.memory_space<vmem>>, vector<1x4x64xf32>
    %52 = vector.shape_cast %51 : vector<1x4x64xf32> to vector<4x64xf32>
    %53 = vector.broadcast %42 : vector<64x1xf32> to vector<64x8xf32>
    %54 = vector.broadcast %36 : vector<1x8xf32> to vector<64x8xf32>
    %55 = arith.mulf %53, %54 : vector<64x8xf32>
    %56 = vector.broadcast %44 : vector<64x1xf32> to vector<64x8xf32>
    %57 = arith.addf %55, %56 : vector<64x8xf32>
    %cst_39 = arith.constant 0.000000e+00 : f32
    %58 = vector.broadcast %cst_39 : f32 to vector<64x8xf32>
    %59 = arith.maximumf %57, %58 : vector<64x8xf32>
    %cst_40 = arith.constant dense<0.000000e+00> : vector<64x8xf32>
    %60 = tpu.matmul %50, %59, %cst_40 {dimension_numbers = #tpu.dot_dimension_numbers<[1], [0], [0], [1], [0, 0, 1, 1], [], []>} : vector<64x64xf32>, vector<64x8xf32>, vector<64x8xf32> -> vector<64x8xf32>
    %61 = vector.broadcast %46 : vector<64x1xf32> to vector<64x8xf32>
    %62 = arith.addf %60, %61 : vector<64x8xf32>
    %cst_41 = arith.constant 0.000000e+00 : f32
    %63 = vector.broadcast %cst_41 : f32 to vector<64x8xf32>
    %64 = arith.maximumf %62, %63 : vector<64x8xf32>
    %cst_42 = arith.constant dense<0.000000e+00> : vector<4x8xf32>
    %65 = tpu.matmul %52, %64, %cst_42 {dimension_numbers = #tpu.dot_dimension_numbers<[1], [0], [0], [1], [0, 0, 1, 1], [], []>} : vector<4x64xf32>, vector<64x8xf32>, vector<4x8xf32> -> vector<4x8xf32>
    %66 = vector.broadcast %48 : vector<4x1xf32> to vector<4x8xf32>
    %67 = arith.addf %65, %66 : vector<4x8xf32>
    %68 = vector.extract_strided_slice %67 {offsets = [0, 0], sizes = [2, 8], strides = [1, 1]} : vector<4x8xf32> to vector<2x8xf32>
    %69 = math.tanh %68 : vector<2x8xf32>
    %70 = vector.extract_strided_slice %69 {offsets = [1, 0], sizes = [1, 8], strides = [1, 1]} : vector<2x8xf32> to vector<1x8xf32>
    %71 = vector.extract_strided_slice %67 {offsets = [3, 0], sizes = [1, 8], strides = [1, 1]} : vector<4x8xf32> to vector<1x8xf32>
    %72 = math.exp %70 : vector<1x8xf32>
    %73 = arith.mulf %1, %72 : vector<1x8xf32>
    %74 = arith.addf %73, %71 : vector<1x8xf32>
    %75 = vector.extract_strided_slice %69 {offsets = [0, 0], sizes = [1, 8], strides = [1, 1]} : vector<2x8xf32> to vector<1x8xf32>
    %76 = arith.addf %40, %75 : vector<1x8xf32>
    %77 = vector.extract_strided_slice %69 {offsets = [1, 0], sizes = [1, 8], strides = [1, 1]} : vector<2x8xf32> to vector<1x8xf32>
    %78 = arith.addf %76, %77 : vector<1x8xf32>
    %c2_43 = arith.constant 2 : index
    %c0_44 = arith.constant 0 : index
    %c0_45 = arith.constant 0 : index
    %79 = vector.load %arg3[%c2_43, %c0_44, %c0_45] : memref<6x64x4xf32, #tpu.memory_space<vmem>>, vector<1x64x1xf32>
    %80 = vector.shape_cast %79 : vector<1x64x1xf32> to vector<64x1xf32>
    %c2_46 = arith.constant 2 : index
    %c0_47 = arith.constant 0 : index
    %c1_48 = arith.constant 1 : index
    %81 = vector.load %arg3[%c2_46, %c0_47, %c1_48] : memref<6x64x4xf32, #tpu.memory_space<vmem>>, vector<1x64x1xf32>
    %82 = vector.shape_cast %81 : vector<1x64x1xf32> to vector<64x1xf32>
    %c2_49 = arith.constant 2 : index
    %c0_50 = arith.constant 0 : index
    %c2_51 = arith.constant 2 : index
    %83 = vector.load %arg3[%c2_49, %c0_50, %c2_51] : memref<6x64x4xf32, #tpu.memory_space<vmem>>, vector<1x64x1xf32>
    %84 = vector.shape_cast %83 : vector<1x64x1xf32> to vector<64x1xf32>
    %c2_52 = arith.constant 2 : index
    %c0_53 = arith.constant 0 : index
    %c3_54 = arith.constant 3 : index
    %85 = vector.load %arg3[%c2_52, %c0_53, %c3_54] : memref<6x64x4xf32, #tpu.memory_space<vmem>>, vector<1x4x1xf32>
    %86 = vector.shape_cast %85 : vector<1x4x1xf32> to vector<4x1xf32>
    %c2_55 = arith.constant 2 : index
    %c0_56 = arith.constant 0 : index
    %c0_57 = arith.constant 0 : index
    %87 = vector.load %arg2[%c2_55, %c0_56, %c0_57] : memref<6x72x64xf32, #tpu.memory_space<vmem>>, vector<1x64x64xf32>
    %88 = vector.shape_cast %87 : vector<1x64x64xf32> to vector<64x64xf32>
    %c2_58 = arith.constant 2 : index
    %c64_59 = arith.constant 64 : index
    %c0_60 = arith.constant 0 : index
    %89 = vector.load %arg2[%c2_58, %c64_59, %c0_60] : memref<6x72x64xf32, #tpu.memory_space<vmem>>, vector<1x4x64xf32>
    %90 = vector.shape_cast %89 : vector<1x4x64xf32> to vector<4x64xf32>
    %91 = vector.broadcast %80 : vector<64x1xf32> to vector<64x8xf32>
    %92 = vector.broadcast %74 : vector<1x8xf32> to vector<64x8xf32>
    %93 = arith.mulf %91, %92 : vector<64x8xf32>
    %94 = vector.broadcast %82 : vector<64x1xf32> to vector<64x8xf32>
    %95 = arith.addf %93, %94 : vector<64x8xf32>
    %cst_61 = arith.constant 0.000000e+00 : f32
    %96 = vector.broadcast %cst_61 : f32 to vector<64x8xf32>
    %97 = arith.maximumf %95, %96 : vector<64x8xf32>
    %cst_62 = arith.constant dense<0.000000e+00> : vector<64x8xf32>
    %98 = tpu.matmul %88, %97, %cst_62 {dimension_numbers = #tpu.dot_dimension_numbers<[1], [0], [0], [1], [0, 0, 1, 1], [], []>} : vector<64x64xf32>, vector<64x8xf32>, vector<64x8xf32> -> vector<64x8xf32>
    %99 = vector.broadcast %84 : vector<64x1xf32> to vector<64x8xf32>
    %100 = arith.addf %98, %99 : vector<64x8xf32>
    %cst_63 = arith.constant 0.000000e+00 : f32
    %101 = vector.broadcast %cst_63 : f32 to vector<64x8xf32>
    %102 = arith.maximumf %100, %101 : vector<64x8xf32>
    %cst_64 = arith.constant dense<0.000000e+00> : vector<4x8xf32>
    %103 = tpu.matmul %90, %102, %cst_64 {dimension_numbers = #tpu.dot_dimension_numbers<[1], [0], [0], [1], [0, 0, 1, 1], [], []>} : vector<4x64xf32>, vector<64x8xf32>, vector<4x8xf32> -> vector<4x8xf32>
    %104 = vector.broadcast %86 : vector<4x1xf32> to vector<4x8xf32>
    %105 = arith.addf %103, %104 : vector<4x8xf32>
    %106 = vector.extract_strided_slice %105 {offsets = [0, 0], sizes = [2, 8], strides = [1, 1]} : vector<4x8xf32> to vector<2x8xf32>
    %107 = math.tanh %106 : vector<2x8xf32>
    %108 = vector.extract_strided_slice %107 {offsets = [0, 0], sizes = [1, 8], strides = [1, 1]} : vector<2x8xf32> to vector<1x8xf32>
    %109 = vector.extract_strided_slice %105 {offsets = [2, 0], sizes = [1, 8], strides = [1, 1]} : vector<4x8xf32> to vector<1x8xf32>
    %110 = math.exp %108 : vector<1x8xf32>
    %111 = arith.mulf %36, %110 : vector<1x8xf32>
    %112 = arith.addf %111, %109 : vector<1x8xf32>
    %113 = vector.extract_strided_slice %107 {offsets = [0, 0], sizes = [1, 8], strides = [1, 1]} : vector<2x8xf32> to vector<1x8xf32>
    %114 = arith.addf %78, %113 : vector<1x8xf32>
    %115 = vector.extract_strided_slice %107 {offsets = [1, 0], sizes = [1, 8], strides = [1, 1]} : vector<2x8xf32> to vector<1x8xf32>
    %116 = arith.addf %114, %115 : vector<1x8xf32>
    %c3_65 = arith.constant 3 : index
    %c0_66 = arith.constant 0 : index
    %c0_67 = arith.constant 0 : index
    %117 = vector.load %arg3[%c3_65, %c0_66, %c0_67] : memref<6x64x4xf32, #tpu.memory_space<vmem>>, vector<1x64x1xf32>
    %118 = vector.shape_cast %117 : vector<1x64x1xf32> to vector<64x1xf32>
    %c3_68 = arith.constant 3 : index
    %c0_69 = arith.constant 0 : index
    %c1_70 = arith.constant 1 : index
    %119 = vector.load %arg3[%c3_68, %c0_69, %c1_70] : memref<6x64x4xf32, #tpu.memory_space<vmem>>, vector<1x64x1xf32>
    %120 = vector.shape_cast %119 : vector<1x64x1xf32> to vector<64x1xf32>
    %c3_71 = arith.constant 3 : index
    %c0_72 = arith.constant 0 : index
    %c2_73 = arith.constant 2 : index
    %121 = vector.load %arg3[%c3_71, %c0_72, %c2_73] : memref<6x64x4xf32, #tpu.memory_space<vmem>>, vector<1x64x1xf32>
    %122 = vector.shape_cast %121 : vector<1x64x1xf32> to vector<64x1xf32>
    %c3_74 = arith.constant 3 : index
    %c0_75 = arith.constant 0 : index
    %c3_76 = arith.constant 3 : index
    %123 = vector.load %arg3[%c3_74, %c0_75, %c3_76] : memref<6x64x4xf32, #tpu.memory_space<vmem>>, vector<1x4x1xf32>
    %124 = vector.shape_cast %123 : vector<1x4x1xf32> to vector<4x1xf32>
    %c3_77 = arith.constant 3 : index
    %c0_78 = arith.constant 0 : index
    %c0_79 = arith.constant 0 : index
    %125 = vector.load %arg2[%c3_77, %c0_78, %c0_79] : memref<6x72x64xf32, #tpu.memory_space<vmem>>, vector<1x64x64xf32>
    %126 = vector.shape_cast %125 : vector<1x64x64xf32> to vector<64x64xf32>
    %c3_80 = arith.constant 3 : index
    %c64_81 = arith.constant 64 : index
    %c0_82 = arith.constant 0 : index
    %127 = vector.load %arg2[%c3_80, %c64_81, %c0_82] : memref<6x72x64xf32, #tpu.memory_space<vmem>>, vector<1x4x64xf32>
    %128 = vector.shape_cast %127 : vector<1x4x64xf32> to vector<4x64xf32>
    %129 = vector.broadcast %118 : vector<64x1xf32> to vector<64x8xf32>
    %130 = vector.broadcast %112 : vector<1x8xf32> to vector<64x8xf32>
    %131 = arith.mulf %129, %130 : vector<64x8xf32>
    %132 = vector.broadcast %120 : vector<64x1xf32> to vector<64x8xf32>
    %133 = arith.addf %131, %132 : vector<64x8xf32>
    %cst_83 = arith.constant 0.000000e+00 : f32
    %134 = vector.broadcast %cst_83 : f32 to vector<64x8xf32>
    %135 = arith.maximumf %133, %134 : vector<64x8xf32>
    %cst_84 = arith.constant dense<0.000000e+00> : vector<64x8xf32>
    %136 = tpu.matmul %126, %135, %cst_84 {dimension_numbers = #tpu.dot_dimension_numbers<[1], [0], [0], [1], [0, 0, 1, 1], [], []>} : vector<64x64xf32>, vector<64x8xf32>, vector<64x8xf32> -> vector<64x8xf32>
    %137 = vector.broadcast %122 : vector<64x1xf32> to vector<64x8xf32>
    %138 = arith.addf %136, %137 : vector<64x8xf32>
    %cst_85 = arith.constant 0.000000e+00 : f32
    %139 = vector.broadcast %cst_85 : f32 to vector<64x8xf32>
    %140 = arith.maximumf %138, %139 : vector<64x8xf32>
    %cst_86 = arith.constant dense<0.000000e+00> : vector<4x8xf32>
    %141 = tpu.matmul %128, %140, %cst_86 {dimension_numbers = #tpu.dot_dimension_numbers<[1], [0], [0], [1], [0, 0, 1, 1], [], []>} : vector<4x64xf32>, vector<64x8xf32>, vector<4x8xf32> -> vector<4x8xf32>
    %142 = vector.broadcast %124 : vector<4x1xf32> to vector<4x8xf32>
    %143 = arith.addf %141, %142 : vector<4x8xf32>
    %144 = vector.extract_strided_slice %143 {offsets = [0, 0], sizes = [2, 8], strides = [1, 1]} : vector<4x8xf32> to vector<2x8xf32>
    %145 = math.tanh %144 : vector<2x8xf32>
    %146 = vector.extract_strided_slice %145 {offsets = [1, 0], sizes = [1, 8], strides = [1, 1]} : vector<2x8xf32> to vector<1x8xf32>
    %147 = vector.extract_strided_slice %143 {offsets = [3, 0], sizes = [1, 8], strides = [1, 1]} : vector<4x8xf32> to vector<1x8xf32>
    %148 = math.exp %146 : vector<1x8xf32>
    %149 = arith.mulf %74, %148 : vector<1x8xf32>
    %150 = arith.addf %149, %147 : vector<1x8xf32>
    %151 = vector.extract_strided_slice %145 {offsets = [0, 0], sizes = [1, 8], strides = [1, 1]} : vector<2x8xf32> to vector<1x8xf32>
    %152 = arith.addf %116, %151 : vector<1x8xf32>
    %153 = vector.extract_strided_slice %145 {offsets = [1, 0], sizes = [1, 8], strides = [1, 1]} : vector<2x8xf32> to vector<1x8xf32>
    %154 = arith.addf %152, %153 : vector<1x8xf32>
    %c4 = arith.constant 4 : index
    %c0_87 = arith.constant 0 : index
    %c0_88 = arith.constant 0 : index
    %155 = vector.load %arg3[%c4, %c0_87, %c0_88] : memref<6x64x4xf32, #tpu.memory_space<vmem>>, vector<1x64x1xf32>
    %156 = vector.shape_cast %155 : vector<1x64x1xf32> to vector<64x1xf32>
    %c4_89 = arith.constant 4 : index
    %c0_90 = arith.constant 0 : index
    %c1_91 = arith.constant 1 : index
    %157 = vector.load %arg3[%c4_89, %c0_90, %c1_91] : memref<6x64x4xf32, #tpu.memory_space<vmem>>, vector<1x64x1xf32>
    %158 = vector.shape_cast %157 : vector<1x64x1xf32> to vector<64x1xf32>
    %c4_92 = arith.constant 4 : index
    %c0_93 = arith.constant 0 : index
    %c2_94 = arith.constant 2 : index
    %159 = vector.load %arg3[%c4_92, %c0_93, %c2_94] : memref<6x64x4xf32, #tpu.memory_space<vmem>>, vector<1x64x1xf32>
    %160 = vector.shape_cast %159 : vector<1x64x1xf32> to vector<64x1xf32>
    %c4_95 = arith.constant 4 : index
    %c0_96 = arith.constant 0 : index
    %c3_97 = arith.constant 3 : index
    %161 = vector.load %arg3[%c4_95, %c0_96, %c3_97] : memref<6x64x4xf32, #tpu.memory_space<vmem>>, vector<1x4x1xf32>
    %162 = vector.shape_cast %161 : vector<1x4x1xf32> to vector<4x1xf32>
    %c4_98 = arith.constant 4 : index
    %c0_99 = arith.constant 0 : index
    %c0_100 = arith.constant 0 : index
    %163 = vector.load %arg2[%c4_98, %c0_99, %c0_100] : memref<6x72x64xf32, #tpu.memory_space<vmem>>, vector<1x64x64xf32>
    %164 = vector.shape_cast %163 : vector<1x64x64xf32> to vector<64x64xf32>
    %c4_101 = arith.constant 4 : index
    %c64_102 = arith.constant 64 : index
    %c0_103 = arith.constant 0 : index
    %165 = vector.load %arg2[%c4_101, %c64_102, %c0_103] : memref<6x72x64xf32, #tpu.memory_space<vmem>>, vector<1x4x64xf32>
    %166 = vector.shape_cast %165 : vector<1x4x64xf32> to vector<4x64xf32>
    %167 = vector.broadcast %156 : vector<64x1xf32> to vector<64x8xf32>
    %168 = vector.broadcast %150 : vector<1x8xf32> to vector<64x8xf32>
    %169 = arith.mulf %167, %168 : vector<64x8xf32>
    %170 = vector.broadcast %158 : vector<64x1xf32> to vector<64x8xf32>
    %171 = arith.addf %169, %170 : vector<64x8xf32>
    %cst_104 = arith.constant 0.000000e+00 : f32
    %172 = vector.broadcast %cst_104 : f32 to vector<64x8xf32>
    %173 = arith.maximumf %171, %172 : vector<64x8xf32>
    %cst_105 = arith.constant dense<0.000000e+00> : vector<64x8xf32>
    %174 = tpu.matmul %164, %173, %cst_105 {dimension_numbers = #tpu.dot_dimension_numbers<[1], [0], [0], [1], [0, 0, 1, 1], [], []>} : vector<64x64xf32>, vector<64x8xf32>, vector<64x8xf32> -> vector<64x8xf32>
    %175 = vector.broadcast %160 : vector<64x1xf32> to vector<64x8xf32>
    %176 = arith.addf %174, %175 : vector<64x8xf32>
    %cst_106 = arith.constant 0.000000e+00 : f32
    %177 = vector.broadcast %cst_106 : f32 to vector<64x8xf32>
    %178 = arith.maximumf %176, %177 : vector<64x8xf32>
    %cst_107 = arith.constant dense<0.000000e+00> : vector<4x8xf32>
    %179 = tpu.matmul %166, %178, %cst_107 {dimension_numbers = #tpu.dot_dimension_numbers<[1], [0], [0], [1], [0, 0, 1, 1], [], []>} : vector<4x64xf32>, vector<64x8xf32>, vector<4x8xf32> -> vector<4x8xf32>
    %180 = vector.broadcast %162 : vector<4x1xf32> to vector<4x8xf32>
    %181 = arith.addf %179, %180 : vector<4x8xf32>
    %182 = vector.extract_strided_slice %181 {offsets = [0, 0], sizes = [2, 8], strides = [1, 1]} : vector<4x8xf32> to vector<2x8xf32>
    %183 = math.tanh %182 : vector<2x8xf32>
    %184 = vector.extract_strided_slice %183 {offsets = [0, 0], sizes = [1, 8], strides = [1, 1]} : vector<2x8xf32> to vector<1x8xf32>
    %185 = vector.extract_strided_slice %181 {offsets = [2, 0], sizes = [1, 8], strides = [1, 1]} : vector<4x8xf32> to vector<1x8xf32>
    %186 = math.exp %184 : vector<1x8xf32>
    %187 = arith.mulf %112, %186 : vector<1x8xf32>
    %188 = arith.addf %187, %185 : vector<1x8xf32>
    %189 = vector.extract_strided_slice %183 {offsets = [0, 0], sizes = [1, 8], strides = [1, 1]} : vector<2x8xf32> to vector<1x8xf32>
    %190 = arith.addf %154, %189 : vector<1x8xf32>
    %191 = vector.extract_strided_slice %183 {offsets = [1, 0], sizes = [1, 8], strides = [1, 1]} : vector<2x8xf32> to vector<1x8xf32>
    %192 = arith.addf %190, %191 : vector<1x8xf32>
    %c5 = arith.constant 5 : index
    %c0_108 = arith.constant 0 : index
    %c0_109 = arith.constant 0 : index
    %193 = vector.load %arg3[%c5, %c0_108, %c0_109] : memref<6x64x4xf32, #tpu.memory_space<vmem>>, vector<1x64x1xf32>
    %194 = vector.shape_cast %193 : vector<1x64x1xf32> to vector<64x1xf32>
    %c5_110 = arith.constant 5 : index
    %c0_111 = arith.constant 0 : index
    %c1_112 = arith.constant 1 : index
    %195 = vector.load %arg3[%c5_110, %c0_111, %c1_112] : memref<6x64x4xf32, #tpu.memory_space<vmem>>, vector<1x64x1xf32>
    %196 = vector.shape_cast %195 : vector<1x64x1xf32> to vector<64x1xf32>
    %c5_113 = arith.constant 5 : index
    %c0_114 = arith.constant 0 : index
    %c2_115 = arith.constant 2 : index
    %197 = vector.load %arg3[%c5_113, %c0_114, %c2_115] : memref<6x64x4xf32, #tpu.memory_space<vmem>>, vector<1x64x1xf32>
    %198 = vector.shape_cast %197 : vector<1x64x1xf32> to vector<64x1xf32>
    %c5_116 = arith.constant 5 : index
    %c0_117 = arith.constant 0 : index
    %c3_118 = arith.constant 3 : index
    %199 = vector.load %arg3[%c5_116, %c0_117, %c3_118] : memref<6x64x4xf32, #tpu.memory_space<vmem>>, vector<1x4x1xf32>
    %200 = vector.shape_cast %199 : vector<1x4x1xf32> to vector<4x1xf32>
    %c5_119 = arith.constant 5 : index
    %c0_120 = arith.constant 0 : index
    %c0_121 = arith.constant 0 : index
    %201 = vector.load %arg2[%c5_119, %c0_120, %c0_121] : memref<6x72x64xf32, #tpu.memory_space<vmem>>, vector<1x64x64xf32>
    %202 = vector.shape_cast %201 : vector<1x64x64xf32> to vector<64x64xf32>
    %c5_122 = arith.constant 5 : index
    %c64_123 = arith.constant 64 : index
    %c0_124 = arith.constant 0 : index
    %203 = vector.load %arg2[%c5_122, %c64_123, %c0_124] : memref<6x72x64xf32, #tpu.memory_space<vmem>>, vector<1x4x64xf32>
    %204 = vector.shape_cast %203 : vector<1x4x64xf32> to vector<4x64xf32>
    %205 = vector.broadcast %194 : vector<64x1xf32> to vector<64x8xf32>
    %206 = vector.broadcast %188 : vector<1x8xf32> to vector<64x8xf32>
    %207 = arith.mulf %205, %206 : vector<64x8xf32>
    %208 = vector.broadcast %196 : vector<64x1xf32> to vector<64x8xf32>
    %209 = arith.addf %207, %208 : vector<64x8xf32>
    %cst_125 = arith.constant 0.000000e+00 : f32
    %210 = vector.broadcast %cst_125 : f32 to vector<64x8xf32>
    %211 = arith.maximumf %209, %210 : vector<64x8xf32>
    %cst_126 = arith.constant dense<0.000000e+00> : vector<64x8xf32>
    %212 = tpu.matmul %202, %211, %cst_126 {dimension_numbers = #tpu.dot_dimension_numbers<[1], [0], [0], [1], [0, 0, 1, 1], [], []>} : vector<64x64xf32>, vector<64x8xf32>, vector<64x8xf32> -> vector<64x8xf32>
    %213 = vector.broadcast %198 : vector<64x1xf32> to vector<64x8xf32>
    %214 = arith.addf %212, %213 : vector<64x8xf32>
    %cst_127 = arith.constant 0.000000e+00 : f32
    %215 = vector.broadcast %cst_127 : f32 to vector<64x8xf32>
    %216 = arith.maximumf %214, %215 : vector<64x8xf32>
    %cst_128 = arith.constant dense<0.000000e+00> : vector<4x8xf32>
    %217 = tpu.matmul %204, %216, %cst_128 {dimension_numbers = #tpu.dot_dimension_numbers<[1], [0], [0], [1], [0, 0, 1, 1], [], []>} : vector<4x64xf32>, vector<64x8xf32>, vector<4x8xf32> -> vector<4x8xf32>
    %218 = vector.broadcast %200 : vector<4x1xf32> to vector<4x8xf32>
    %219 = arith.addf %217, %218 : vector<4x8xf32>
    %220 = vector.extract_strided_slice %219 {offsets = [0, 0], sizes = [2, 8], strides = [1, 1]} : vector<4x8xf32> to vector<2x8xf32>
    %221 = math.tanh %220 : vector<2x8xf32>
    %222 = vector.extract_strided_slice %221 {offsets = [1, 0], sizes = [1, 8], strides = [1, 1]} : vector<2x8xf32> to vector<1x8xf32>
    %223 = vector.extract_strided_slice %219 {offsets = [3, 0], sizes = [1, 8], strides = [1, 1]} : vector<4x8xf32> to vector<1x8xf32>
    %224 = math.exp %222 : vector<1x8xf32>
    %225 = arith.mulf %150, %224 : vector<1x8xf32>
    %226 = arith.addf %225, %223 : vector<1x8xf32>
    %227 = vector.extract_strided_slice %221 {offsets = [0, 0], sizes = [1, 8], strides = [1, 1]} : vector<2x8xf32> to vector<1x8xf32>
    %228 = arith.addf %192, %227 : vector<1x8xf32>
    %229 = vector.extract_strided_slice %221 {offsets = [1, 0], sizes = [1, 8], strides = [1, 1]} : vector<2x8xf32> to vector<1x8xf32>
    %230 = arith.addf %228, %229 : vector<1x8xf32>
    %c0_129 = arith.constant 0 : index
    %c0_130 = arith.constant 0 : index
    %231 = vector.load %arg4[%c0_129, %c0_130] : memref<3x8xf32, #tpu.memory_space<vmem>>, vector<1x8xf32>
    tpu.vector_store %arg4[%c0_129, %c0_130], %188 {strides = array<i32>} : memref<3x8xf32, #tpu.memory_space<vmem>>, vector<1x8xf32>,
    %c1_131 = arith.constant 1 : index
    %c0_132 = arith.constant 0 : index
    %232 = vector.load %arg4[%c1_131, %c0_132] : memref<3x8xf32, #tpu.memory_space<vmem>>, vector<1x8xf32>
    tpu.vector_store %arg4[%c1_131, %c0_132], %226 {strides = array<i32>} : memref<3x8xf32, #tpu.memory_space<vmem>>, vector<1x8xf32>,
    %c2_133 = arith.constant 2 : index
    %c0_134 = arith.constant 0 : index
    %233 = vector.load %arg4[%c2_133, %c0_134] : memref<3x8xf32, #tpu.memory_space<vmem>>, vector<1x8xf32>
    tpu.vector_store %arg4[%c2_133, %c0_134], %230 {strides = array<i32>} : memref<3x8xf32, #tpu.memory_space<vmem>>, vector<1x8xf32>,
    return
  }
  func.func @transform_0(%arg0: i32) -> (i32, i32) {
    %c0_i32 = arith.constant 0 : i32
    %c0_i32_0 = arith.constant 0 : i32
    return %c0_i32, %arg0 : i32, i32
  }
  func.func @transform_1(%arg0: i32) -> (i32, i32, i32) {
    %c0_i32 = arith.constant 0 : i32
    %c0_i32_0 = arith.constant 0 : i32
    %c0_i32_1 = arith.constant 0 : i32
    %c0_i32_2 = arith.constant 0 : i32
    return %c0_i32, %c0_i32_0, %c0_i32_1 : i32, i32, i32
  }
  func.func @transform_2(%arg0: i32) -> (i32, i32, i32) {
    %c0_i32 = arith.constant 0 : i32
    %c0_i32_0 = arith.constant 0 : i32
    %c0_i32_1 = arith.constant 0 : i32
    %c0_i32_2 = arith.constant 0 : i32
    return %c0_i32, %c0_i32_0, %c0_i32_1 : i32, i32, i32
  }
  func.func @transform_3(%arg0: i32) -> (i32, i32) {
    %c0_i32 = arith.constant 0 : i32
    %c0_i32_0 = arith.constant 0 : i32
    return %c0_i32, %arg0 : i32, i32
  }
}

</mosaic_0001>

<bundles_post_ra>
// kernel: tpu_custom_call.1
= control target key start
LH: loop header
LB: loop body
LE: loop exit
PB: predicated region body
PF: predicated region fallthrough
CT: control target
= control target key end

     0   :  { %v3202_v2 = vmov 1   ;;  %s3789_s0 = inlined_call_operand.vmem [shape: f32[2,8], index: 0, kind: input, shape index: {}]   ;;  %s3790_s1 = inlined_call_operand.vmem [shape: f32[6,72,64], index: 1, kind: input, shape index: {}]   ;;  %s3791_s2 = inlined_call_operand.vmem [shape: f32[6,64,4], index: 2, kind: input, shape index: {}]   ;;  %s3792_s3 = inlined_call_operand.hbm [shape: f32[3,8], index: 3, kind: output, shape index: {}]  }
   0x1   :  { %v19_v0 = vld [vmem:[%s3791_s2 + $0x10] sm:$0xff]  ;;  %v17_v1 = vld [vmem:[%s3791_s2] sm:$0xff]  ;;  %3077 = vset.pattern.permute.xlu0 %v3202_v2  ;;  %3075 = vset.pattern.permute.xlu1 %v3202_v2 }
   0x2   :  { %96 = vperm.xlu0 %3077, %v19_v0   ;;  %88 = vperm.xlu1 %3075, %v17_v1  }
   0x3   :  { %8 = vsyncpa [#allocation3], 0  ;;  %v18_v3 = vld [vmem:[%s3791_s2 + $0x8] sm:$0xff]  ;;  %v3203_v4 = vmov 0   ;;  %v20_v5 = vld [vmem:[%s3791_s2 + $0x18] sm:$0xff]  ;;  %vm167_vm0 = vcmask 523264   ;;  %v75_v12 = vlaneseq }
   0x4   :  { %v22_v6 = vld [vmem:[%s3791_s2 + $0x28] sm:$0xff]  ;;  %v21_v7 = vld [vmem:[%s3791_s2 + $0x20] sm:$0xff]  ;;  %v23_v8 = vld [vmem:[%s3791_s2 + $0x30] sm:$0xff]  ;;  %v3204_v11 = vmov 2   ;;  %vm3206_vm1 = vmmov 0   ;;  %vm2305_vm2 = vcmask 57344  }
   0x5   :  { %v24_v9 = vld [vmem:[%s3791_s2 + $0x38] sm:$0xff]  ;;  %v26_v10 = vld [vmem:[%s3790_s1] sm:$0xff]  ;;  %v76_v13 = vshrl.u32 %v75_v12, 7  ;;  %v27_v61 = vld [vmem:[%s3790_s1 + $0x8] sm:$0xff]  ;;  %s3209_s9 = smov [#allocation2]  }
   0x6   :  { %3078 = vset.pattern.permute.xlu0 %v3203_v4  ;;  %92 = vperm.xlu1 %3075, %v18_v3   ;;  %v3276_v15 = vld [vmem:[%s3789_s0 + $0x1] sm:$0x1]  ;;  %v28_v62 = vld [vmem:[%s3790_s1 + $0x10] sm:$0xff]  ;;  %v29_v63 = vld [vmem:[%s3790_s1 + $0x18] sm:$0xff] }
   0x7   :  { %37 = vperm.xlu0 %3078, %v17_v1   ;;  %2633 = vmatprep.mubr.msk.f32.mxu0 %vm167_vm0, %v26_v10  ;;  %v3271_v14 = vsub.s32 0, %v76_v13  ;;  %v3208_v10 = vmov 3   ;;  %v2333_v12 = vld [vmem:[%s3791_s2 + $0x48] sm:$0xff]  ;;  %v2336_v13 = vld [vmem:[%s3791_s2 + $0x60] sm:$0xff] }
   0x9   :  { %v78_v18 = vrot.slane %v3276_v15, %v3271_v14 }
   0xa   :  { %3076 = vset.pattern.permute.xlu1 %v3203_v4 }
   0xb   :  { %42 = vperm.xlu0 %3078, %v18_v3   ;;  %52 = vperm.xlu1 %3076, %v20_v5  }
   0xf   :  { %47 = vperm.xlu0 %3078, %v19_v0   ;;  %3079 = vset.pattern.permute.xlu1 %v3202_v2 }
  0x10   :  { %100 = vperm.xlu1 %3079, %v20_v5  }
  0x13   :  { %62 = vperm.xlu0 %3078, %v22_v6  }
  0x14   :  { %3080 = vset.pattern.permute.xlu1 %v3203_v4 }
  0x15   :  { %57 = vperm.xlu1 %3080, %v21_v7  }
  0x17   :  { %67 = vperm.xlu0 %3078, %v23_v8  }
  0x19   :  { %3081 = vset.pattern.permute.xlu1 %v3202_v2 }
  0x1a   :  { %104 = vperm.xlu1 %3081, %v21_v7  }
  0x1b   :  { %3083 = vset.pattern.permute.xlu0 %v3202_v2 }
  0x1c   :  { %112 = vperm.xlu0 %3083, %v23_v8  }
  0x1e   :  { %108 = vperm.xlu1 %3081, %v22_v6  }
  0x20   :  { %3086 = vset.pattern.permute.xlu0 %v3204_v11 }
  0x21   :  { %140 = vperm.xlu0 %3086, %v18_v3   ;;  %v32_v3 = vld [vmem:[%s3790_s1 + $0x30] sm:$0xff] }
  0x22   :  { %3082 = vset.pattern.permute.xlu1 %v3203_v4 }
  0x23   :  { %72 = vperm.xlu1 %3082, %v24_v9  }
  0x25   :  { %152 = vperm.xlu0 %3086, %v21_v7   ;;  %v3207_v7 = vmov 0.0  }
  0x26   :  { %2661 = vmatprep.mubr.msk.f32.mxu1 %vm3206_vm1, %v3207_v7 }
  0x27   :  { %3084 = vset.pattern.permute.xlu1 %v3202_v2 }
  0x28   :  { %116 = vperm.xlu1 %3084, %v24_v9  }
  0x29   :  { %160 = vperm.xlu0 %3086, %v23_v8   ;;  %v2332_v8 = vld [vmem:[%s3791_s2 + $0x40] sm:$0xff] }
  0x2c   :  { %3085 = vset.pattern.permute.xlu1 %v3204_v11 }
  0x2d   :  { %136 = vperm.xlu1 %3085, %v17_v1   ;;  %v31_v1 = vld [vmem:[%s3790_s1 + $0x28] sm:$0xff]  ;;  %3087 = vset.pattern.permute.xlu0 %v3208_v10 }
  0x31   :  { %144 = vperm.xlu1 %3085, %v19_v0   ;;  %v30_v0 = vld [vmem:[%s3790_s1 + $0x20] sm:$0xff] }
  0x35   :  { %148 = vperm.xlu1 %3085, %v20_v5   ;;  %v33_v5 = vld [vmem:[%s3790_s1 + $0x38] sm:$0xff] }
  0x39   :  { %156 = vperm.xlu1 %3085, %v22_v6   ;;  %v3205_v6 = vmov 0.0|0.0  }
  0x3a   :  { %2915 = vmatprep.subr.bf16.mxu1 %v3205_v6 }
  0x3d   :  { %164 = vperm.xlu1 %3085, %v24_v9   ;;  %v25_v9 = vld [vmem:[%s3791_s2] sm:$0xf] }
  0x3e   :  { %307 = vperm.xlu0 %3087, %v25_v9  }
  0x41   :  { %3088 = vset.pattern.permute.xlu1 %v3203_v4 }
  0x42   :  { %418 = vperm.xlu1 %3088, %v2332_v8   ;;  %3089 = vset.pattern.permute.xlu0 %v3202_v2 }
  0x43   :  { %469 = vperm.xlu0 %3089, %v2332_v8  }
  0x46   :  { %423 = vperm.xlu1 %3088, %v2333_v12  }
  0x47   :  { %485 = vperm.xlu0 %3089, %v2336_v13  }
  0x4a   :  { %3090 = vset.pattern.permute.xlu1 %v3202_v2 }
  0x4b   :  { %473 = vperm.xlu1 %3090, %v2333_v12   ;;  %3094 = vset.pattern.permute.xlu0 %v3203_v4 }
  0x4f   :  { %3091 = vset.pattern.permute.xlu1 %v3203_v4 }
  0x81   :  { %v89_v16 = vpop.permute.xlu1 %88  ;;  %v97_v17 = vpop.permute.xlu0 %96 }
  0x85   :  { %v93_v19 = vpop.permute.xlu1 %92 }
  0x86   :  { %v38_v20 = vpop.permute.xlu0 %37 }
  0x87   :  { %v79_v21 = vmul.f32 %v78_v18, %v38_v20  ;;  %v2338_v20 = vld [vmem:[%s3791_s2 + $0x70] sm:$0xff] }
  0x89   :  { %v119_v24 = vadd.f32 %v89_v16, %v79_v21  ;;  %v2334_v16 = vld [vmem:[%s3791_s2 + $0x50] sm:$0xff] }
  0x8a   :  { %v43_v22 = vpop.permute.xlu0 %42  ;;  %v53_v23 = vpop.permute.xlu1 %52  ;;  %428 = vperm.xlu1 %3091, %v2334_v16  }
  0x8b   :  { %v80_v25 = vmul.f32 %v78_v18, %v43_v22  ;;  %v82_v27 = vmul.f32 %v78_v18, %v53_v23  ;;  %v127_v31 = vmax.f32 %v119_v24, 0.0 }
  0x8d   :  { %v120_v26 = vadd.f32 %v93_v19, %v80_v25  ;;  %v2337_v19 = vld [vmem:[%s3791_s2 + $0x68] sm:$0xff] }
  0x8e   :  { %v48_v28 = vpop.permute.xlu0 %47  ;;  %3092 = vset.pattern.permute.xlu1 %v3202_v2 }
  0x8f   :  { %v81_v29 = vmul.f32 %v78_v18, %v48_v28  ;;  %v101_v30 = vpop.permute.xlu1 %100  ;;  %v128_v32 = vmax.f32 %v120_v26, 0.0  ;;  %477 = vperm.xlu1 %3092, %v2334_v16  }
  0x90   :  { %v122_v33 = vadd.f32 %v101_v30, %v82_v27 }
  0x91   :  { %v121_v34 = vadd.f32 %v97_v17, %v81_v29  ;;  %v2899_v35 = vpack.c.bf16 %v128_v32, %v127_v31  ;;  %v2335_v17 = vld [vmem:[%s3791_s2 + $0x58] sm:$0xff] }
  0x92   :  { %v130_v36 = vmax.f32 %v122_v33, 0.0  ;;  %v63_v40 = vpop.permute.xlu0 %62  ;;  %433 = vperm.xlu0 %3094, %v2335_v17  }
  0x93   :  { %v129_v37 = vmax.f32 %v121_v34, 0.0  ;;  %2900 = vmatprep.subr.bf16.mxu0 %v2899_v35  ;;  %v84_v43 = vmul.f32 %v78_v18, %v63_v40  ;;  %481 = vperm.xlu1 %3092, %v2335_v17  }
  0x94   :  { %v58_v38 = vpop.permute.xlu1 %57  ;;  %2902 = vmatpush3.bf16.msra.mxu0 %v2899_v35 }
  0x95   :  { %v2903_v39 = vpack.c.bf16 %v130_v36, %v129_v37  ;;  %v83_v42 = vmul.f32 %v78_v18, %v58_v38 }
  0x96   :  { %v68_v45 = vpop.permute.xlu0 %67  ;;  %438 = vperm.xlu0 %3094, %v2336_v13  }
  0x97   :  { %2904 = vmatprep.subr.bf16.mxu0 %v2903_v39  ;;  %v85_v53 = vmul.f32 %v78_v18, %v68_v45  ;;  %3093 = vset.pattern.permute.xlu1 %v3203_v4 }
  0x98   :  { %2906 = vmatpush3.bf16.msra.mxu0 %v2903_v39  ;;  %443 = vperm.xlu1 %3093, %v2337_v19  }
  0x99   :  { %v105_v41 = vpop.permute.xlu1 %104 }
  0x9a   :  { %v123_v44 = vadd.f32 %v105_v41, %v83_v42 }
  0x9b   :  { %v113_v52 = vpop.permute.xlu0 %112 }
  0x9c   :  { %v131_v48 = vmax.f32 %v123_v44, 0.0  ;;  %v125_v54 = vadd.f32 %v113_v52, %v85_v53  ;;  %3095 = vset.pattern.permute.xlu1 %v3202_v2 }
  0x9d   :  { %v109_v46 = vpop.permute.xlu1 %108  ;;  %489 = vperm.xlu1 %3095, %v2337_v19  }
  0x9e   :  { %v124_v47 = vadd.f32 %v109_v46, %v84_v43  ;;  %v133_v58 = vmax.f32 %v125_v54, 0.0 }
  0xa0   :  { %v132_v49 = vmax.f32 %v124_v47, 0.0  ;;  %v141_v23 = vpop.permute.xlu0 %140 }
  0xa1   :  { %3096 = vset.pattern.permute.xlu1 %v3203_v4 }
  0xa2   :  { %v73_v50 = vpop.permute.xlu1 %72  ;;  %v2907_v51 = vpack.c.bf16 %v132_v49, %v131_v48  ;;  %448 = vperm.xlu1 %3096, %v2338_v20  }
  0xa3   :  { %v86_v55 = vmul.f32 %v78_v18, %v73_v50  ;;  %v2339_v18 = vld [vmem:[%s3791_s2 + $0x78] sm:$0xff] }
  0xa4   :  { %2908 = vmatprep.subr.bf16.mxu0 %v2907_v51  ;;  %453 = vperm.xlu0 %3094, %v2339_v18   ;;  %v153_v37 = vpop.permute.xlu0 %152 }
  0xa5   :  { %2910 = vmatpush3.bf16.msra.mxu0 %v2907_v51 }
  0xa6   :  { %3097 = vset.pattern.permute.xlu1 %v3202_v2 }
  0xa7   :  { %v117_v56 = vpop.permute.xlu1 %116  ;;  %493 = vperm.xlu1 %3097, %v2338_v20  }
  0xa8   :  { %v126_v57 = vadd.f32 %v117_v56, %v86_v55  ;;  %3098 = vset.pattern.permute.xlu0 %v3204_v11  ;;  %v161_v49 = vpop.permute.xlu0 %160 }
  0xa9   :  { %517 = vperm.xlu0 %3098, %v2332_v8  }
  0xaa   :  { %v134_v59 = vmax.f32 %v126_v57, 0.0  ;;  %v34_v57 = vld [vmem:[%s3790_s1 + $0x40] sm:$0xf] }
  0xab   :  { %497 = vperm.xlu1 %3097, %v2339_v18  }
  0xac   :  { %v2911_v60 = vpack.c.bf16 %v134_v59, %v133_v58  ;;  %v137_v21 = vpop.permute.xlu1 %136  ;;  %v2341_v58 = vld [vmem:[%s3790_s1 + $0x48] sm:$0xff] }
  0xad   :  { %529 = vperm.xlu0 %3098, %v2335_v17  }
  0xae   :  { %2912 = vmatprep.subr.bf16.mxu0 %v2911_v60 }
  0xaf   :  { %2914 = vmatpush3.bf16.msra.mxu0 %v2911_v60  ;;  %3099 = vset.pattern.permute.xlu1 %v3204_v11 }
  0xb0   :  { %521 = vperm.xlu1 %3099, %v2333_v12   ;;  %v145_v22 = vpop.permute.xlu1 %144 }
  0xb1   :  { %537 = vperm.xlu0 %3098, %v2337_v19  }
  0xb2   :  { %2634 = vmatmul.mubr.msk.f32.vlgmr.msra.gmra.mrb[0].mxu0 %vm167_vm0, %v27_v61 }
  0xb3   :  { %2636 = vmatprep.mubr.msk.f32.mxu0 %vm167_vm0, %v28_v62 }
  0xb4   :  { %525 = vperm.xlu1 %3099, %v2334_v16   ;;  %v149_v24 = vpop.permute.xlu1 %148 }
  0xb5   :  { %545 = vperm.xlu0 %3098, %v2339_v18  }
  0xb6   :  { %2637 = vmatmul.mubr.msk.f32.gmra.mrb[2].mxu0 %vm167_vm0, %v29_v63 }
  0xb7   :  { %2639 = vmatprep.mubr.msk.f32.mxu0 %vm167_vm0, %v30_v0 }
  0xb8   :  { %533 = vperm.xlu1 %3099, %v2336_v13   ;;  %v157_v34 = vpop.permute.xlu1 %156 }
  0xb9   :  { %3101 = vset.pattern.permute.xlu0 %v3203_v4 }
  0xba   :  { %2640 = vmatmul.mubr.msk.f32.gmra.mrb[4].mxu0 %vm167_vm0, %v31_v1 }
  0xbb   :  { %2642 = vmatprep.mubr.msk.f32.mxu0 %vm167_vm0, %v32_v3 }
  0xbc   :  { %541 = vperm.xlu1 %3099, %v2338_v20   ;;  %v165_v46 = vpop.permute.xlu1 %164  ;;  %v15_v20 = vld [vmem:[%s3789_s0] sm:$0x1] }
  0xbd   :  { %v308_v63 = vpop.permute.xlu0 %307 }
  0xbe   :  { %2643 = vmatmul.mubr.msk.f32.gmra.mrb[6].mxu0 %vm167_vm0, %v33_v5 }
  0xbf   :  { %2680 = vmatprep.mubr.msk.f32.mxu0 %vm167_vm0, %v2341_v58 }
  0xc0   :  { %3100 = vset.pattern.permute.xlu1 %v3208_v10 }
  0xc1   :  { %v419_v59 = vpop.permute.xlu1 %418 }
  0xc2   :  { %v470_v9 = vpop.permute.xlu0 %469 }
  0xc5   :  { %v424_v60 = vpop.permute.xlu1 %423 }
  0xc6   :  { %v486_v17 = vpop.permute.xlu0 %485 }
  0xca   :  { %v474_v61 = vpop.permute.xlu1 %473 }
 0x109   :  { %v429_v62 = vpop.permute.xlu1 %428 }
 0x10e   :  { %v478_v5 = vpop.permute.xlu1 %477 }
 0x111   :  { %v434_v19 = vpop.permute.xlu0 %433 }
 0x112   :  { %v482_v8 = vpop.permute.xlu1 %481 }
 0x117   :  { %v444_v16 = vpop.permute.xlu1 %443 }
 0x11c   :  { %v490_v18 = vpop.permute.xlu1 %489 }
 0x185   :  { %v2635_v25 = vpop.f32.mrb[0].mxu0 }
 0x186   :  { %v264_v26 = vadd.f32 %v2635_v25, %v141_v23  ;;  %v258_v27 = vpop.f32.mrb[1].mxu0  ;;  %v439_v25 = vpop.permute.xlu0 %438 }
 0x187   :  { %v259_v28 = vadd.f32 %v258_v27, %v137_v21 }
 0x188   :  { %v298_v29 = vmax.f32 %v264_v26, 0.0 }
 0x189   :  { %v297_v30 = vmax.f32 %v259_v28, 0.0  ;;  %v2638_v31 = vpop.f32.mrb[2].mxu0 }
 0x18a   :  { %v274_v32 = vadd.f32 %v2638_v31, %v149_v24  ;;  %v268_v33 = vpop.f32.mrb[3].mxu0 }
 0x18b   :  { %v269_v35 = vadd.f32 %v268_v33, %v145_v22  ;;  %v2916_v36 = vpack.c.bf16 %v298_v29, %v297_v30  ;;  %v449_v22 = vpop.permute.xlu1 %448  ;;  %v454_v33 = vpop.permute.xlu0 %453 }
 0x18c   :  { %v300_v38 = vmax.f32 %v274_v32, 0.0 }
 0x18d   :  { %v299_v39 = vmax.f32 %v269_v35, 0.0  ;;  %v2641_v40 = vpop.f32.mrb[4].mxu0  ;;  %2917 = vmatpush3.bf16.msra.mxu1 %v2916_v36 }
 0x18e   :  { %v284_v41 = vadd.f32 %v2641_v40, %v157_v34  ;;  %v278_v42 = vpop.f32.mrb[5].mxu0  ;;  %2918 = vmatprep.subr.bf16.mxu1 %v3205_v6 }
 0x18f   :  { %v2919_v43 = vpack.c.bf16 %v300_v38, %v299_v39  ;;  %v279_v44 = vadd.f32 %v278_v42, %v153_v37  ;;  %v494_v28 = vpop.permute.xlu1 %493 }
 0x190   :  { %v302_v45 = vmax.f32 %v284_v41, 0.0 }
 0x191   :  { %v301_v47 = vmax.f32 %v279_v44, 0.0  ;;  %v2644_v48 = vpop.f32.mrb[6].mxu0  ;;  %2920 = vmatpush3.bf16.msra.mxu1 %v2919_v43 }
 0x192   :  { %v294_v50 = vadd.f32 %v2644_v48, %v165_v46  ;;  %v288_v51 = vpop.f32.mrb[7].mxu0  ;;  %2921 = vmatprep.subr.bf16.mxu1 %v3205_v6 }
 0x193   :  { %v2922_v52 = vpack.c.bf16 %v302_v45, %v301_v47  ;;  %v289_v53 = vadd.f32 %v288_v51, %v161_v49  ;;  %v498_v48 = vpop.permute.xlu1 %497 }
 0x194   :  { %v304_v54 = vmax.f32 %v294_v50, 0.0 }
 0x195   :  { %v303_v55 = vmax.f32 %v289_v53, 0.0  ;;  %2923 = vmatpush3.bf16.msra.mxu1 %v2922_v52 }
 0x196   :  { %2924 = vmatprep.subr.bf16.mxu1 %v3205_v6 }
 0x197   :  { %v2925_v56 = vpack.c.bf16 %v304_v54, %v303_v55 }
 0x199   :  { %2926 = vmatpush3.bf16.msra.mxu1 %v2925_v56 }
 0x19a   :  { %2943 = vmatprep.subr.bf16.mxu1 %v3205_v6 }
 0x19c   :  { %2662 = vmatmul.mubr.msk.f32.vlgmr.msra.gmra.mrb[0].mxu1 %vm167_vm0, %v34_v57 }
 0x19d   :  { %2708 = vmatprep.mubr.msk.f32.mxu1 %vm3206_vm1, %v3207_v7 }
 0x26f   :  { %v379_v0 = vpop.f32.mrb[0].mxu1 }
 0x270   :  { %v380_v1 = vadd.f32 %v379_v0, %v308_v63  ;;  %v2663_v3 = vpop.f32.mrb[1].mxu1  ;;  %v2346_v63 = vld [vmem:[%s3790_s1 + $0x70] sm:$0xff]  ;;  %v2347_v0 = vld [vmem:[%s3790_s1 + $0x78] sm:$0xff] }
 0x271   :  { %v2340_v3 = vld [vmem:[%s3791_s2 + $0x40] sm:$0xf] }
 0x272   :  { %3154 = vtanh.f32 %v380_v1  ;;  %v388_v24 = vrot.slane %v380_v1, 2  ;;  %v2348_v1 = vld [vmem:[%s3790_s1 + $0x80] sm:$0xff]  ;;  %687 = vperm.xlu1 %3100, %v2340_v3  }
 0x276   :  { %3102 = vset.pattern.permute.xlu1 %v3203_v4 }
 0x27c   :  { %v3366_v12 = vpop.eup %3154 }
 0x27d   :  { %v384_v13 = vmul.f32 1.442695, %v3366_v12 }
 0x27f   :  { %3156 = vpow2.f32 %v384_v13  ;;  %v2361_v13 = vld [vmem:[%s3791_s2 + $0x90] sm:$0xff] }
 0x289   :  { %v3157_v21 = vpop.eup %3156 }
 0x28a   :  { %v386_v23 = vmul.f32 %v3157_v21, %v15_v20  ;;  %v518_v20 = vpop.permute.xlu0 %517  ;;  %v522_v21 = vpop.permute.xlu1 %521 }
 0x28c   :  { %v3372_v26 = vadd.f32 %v388_v24, %v386_v23 }
 0x28e   :  { %v459_v27 = vrot.slane %v3372_v26, %v3271_v14  ;;  %v526_v24 = vpop.permute.xlu1 %525 }
 0x290   :  { %v461_v29 = vmul.f32 %v459_v27, %v424_v60  ;;  %v462_v30 = vmul.f32 %v459_v27, %v429_v62  ;;  %v460_v31 = vmul.f32 %v459_v27, %v419_v59  ;;  %v465_v32 = vmul.f32 %v459_v27, %v444_v16  ;;  %v2342_v59 = vld [vmem:[%s3790_s1 + $0x50] sm:$0xff]  ;;  %v2343_v60 = vld [vmem:[%s3790_s1 + $0x58] sm:$0xff]  ;;  %v2345_v62 = vld [vmem:[%s3790_s1 + $0x68] sm:$0xff] }
 0x291   :  { %v463_v34 = vmul.f32 %v459_v27, %v434_v19  ;;  %v464_v35 = vmul.f32 %v459_v27, %v439_v25  ;;  %v466_v41 = vmul.f32 %v459_v27, %v449_v22  ;;  %v467_v42 = vmul.f32 %v459_v27, %v454_v33  ;;  %v2362_v16 = vld [vmem:[%s3791_s2 + $0x98] sm:$0xff]  ;;  %v530_v22 = vpop.permute.xlu0 %529 }
 0x292   :  { %v501_v36 = vadd.f32 %v474_v61, %v461_v29  ;;  %v502_v37 = vadd.f32 %v478_v5, %v462_v30  ;;  %v500_v38 = vadd.f32 %v470_v9, %v460_v31  ;;  %v505_v39 = vadd.f32 %v490_v18, %v465_v32  ;;  %v2344_v61 = vld [vmem:[%s3790_s1 + $0x60] sm:$0xff]  ;;  %v2360_v9 = vld [vmem:[%s3791_s2 + $0x88] sm:$0xff]  ;;  %v2365_v18 = vld [vmem:[%s3791_s2 + $0xb0] sm:$0xff] }
 0x293   :  { %v503_v40 = vadd.f32 %v482_v8, %v463_v34  ;;  %v504_v46 = vadd.f32 %v486_v17, %v464_v35  ;;  %v506_v50 = vadd.f32 %v494_v28, %v466_v41  ;;  %v507_v53 = vadd.f32 %v498_v48, %v467_v42  ;;  %v2359_v5 = vld [vmem:[%s3791_s2 + $0x80] sm:$0xff]  ;;  %806 = vperm.xlu1 %3102, %v2360_v9   ;;  %v2364_v17 = vld [vmem:[%s3791_s2 + $0xa8] sm:$0xff]  ;;  %v2366_v19 = vld [vmem:[%s3791_s2 + $0xb8] sm:$0xff] }
 0x294   :  { %v509_v43 = vmax.f32 %v501_v36, 0.0  ;;  %v510_v44 = vmax.f32 %v502_v37, 0.0  ;;  %v508_v45 = vmax.f32 %v500_v38, 0.0  ;;  %v513_v51 = vmax.f32 %v505_v39, 0.0  ;;  %801 = vperm.xlu0 %3101, %v2359_v5   ;;  %v2363_v8 = vld [vmem:[%s3791_s2 + $0xa0] sm:$0xff]  ;;  %v534_v37 = vpop.permute.xlu1 %533 }
 0x295   :  { %v511_v47 = vmax.f32 %v503_v40, 0.0  ;;  %v512_v52 = vmax.f32 %v504_v46, 0.0  ;;  %v514_v55 = vmax.f32 %v506_v50, 0.0  ;;  %v515_v56 = vmax.f32 %v507_v53, 0.0  ;;  %v538_v34 = vpop.permute.xlu0 %537 }
 0x296   :  { %v2927_v49 = vpack.c.bf16 %v509_v43, %v508_v45 }
 0x297   :  { %v2931_v54 = vpack.c.bf16 %v511_v47, %v510_v44  ;;  %v2935_v57 = vpack.c.bf16 %v513_v51, %v512_v52  ;;  %v2939_v58 = vpack.c.bf16 %v515_v56, %v514_v55  ;;  %3103 = vset.pattern.permute.xlu1 %v3202_v2 }
 0x298   :  { %2928 = vmatprep.subr.bf16.mxu0 %v2927_v49  ;;  %821 = vperm.xlu0 %3101, %v2363_v8  }
 0x299   :  { %2930 = vmatpush3.bf16.msra.mxu0 %v2927_v49  ;;  %852 = vperm.xlu1 %3103, %v2359_v5   ;;  %v546_v46 = vpop.permute.xlu0 %545  ;;  %v542_v49 = vpop.permute.xlu1 %541 }
 0x29a   :  { %2932 = vmatprep.subr.bf16.mxu0 %v2931_v54 }
 0x29c   :  { %3106 = vset.pattern.permute.xlu0 %v3202_v2 }
 0x29d   :  { %2934 = vmatpush3.bf16.msra.mxu0 %v2931_v54  ;;  %856 = vperm.xlu0 %3106, %v2360_v9  }
 0x29e   :  { %2936 = vmatprep.subr.bf16.mxu0 %v2935_v57  ;;  %3104 = vset.pattern.permute.xlu1 %v3203_v4 }
 0x29f   :  { %811 = vperm.xlu1 %3104, %v2361_v13  }
 0x2a1   :  { %2938 = vmatpush3.bf16.msra.mxu0 %v2935_v57  ;;  %860 = vperm.xlu0 %3106, %v2361_v13   ;;  %v2349_v57 = vld [vmem:[%s3790_s1 + $0x88] sm:$0xf] }
 0x2a2   :  { %2940 = vmatprep.subr.bf16.mxu0 %v2939_v58 }
 0x2a3   :  { %816 = vperm.xlu1 %3104, %v2362_v16  }
 0x2a5   :  { %2942 = vmatpush3.bf16.msra.mxu0 %v2939_v58  ;;  %872 = vperm.xlu0 %3106, %v2364_v17   ;;  %v2368_v58 = vld [vmem:[%s3790_s1 + $0x90] sm:$0xff] }
 0x2a7   :  { %3105 = vset.pattern.permute.xlu1 %v3202_v2 }
 0x2a8   :  { %2681 = vmatmul.mubr.msk.f32.vlgmr.msra.gmra.mrb[8].mxu0 %vm167_vm0, %v2342_v59  ;;  %864 = vperm.xlu1 %3105, %v2362_v16  }
 0x2a9   :  { %2683 = vmatprep.mubr.msk.f32.mxu0 %vm167_vm0, %v2343_v60  ;;  %876 = vperm.xlu0 %3106, %v2365_v18  }
 0x2ac   :  { %2684 = vmatmul.mubr.msk.f32.gmra.mrb[10].mxu0 %vm167_vm0, %v2344_v61  ;;  %3107 = vset.pattern.permute.xlu1 %v3203_v4 }
 0x2ad   :  { %2686 = vmatprep.mubr.msk.f32.mxu0 %vm167_vm0, %v2345_v62  ;;  %3111 = vset.pattern.permute.xlu0 %v3204_v11 }
 0x2ae   :  { %900 = vperm.xlu0 %3111, %v2359_v5   ;;  %826 = vperm.xlu1 %3107, %v2364_v17   ;;  %v393_v5 = vrot.slane %v3366_v12, 1 }
 0x2b0   :  { %2687 = vmatmul.mubr.msk.f32.gmra.mrb[12].mxu0 %vm167_vm0, %v2346_v63 }
 0x2b1   :  { %2689 = vmatprep.mubr.msk.f32.mxu0 %vm167_vm0, %v2347_v0 }
 0x2b2   :  { %912 = vperm.xlu0 %3111, %v2362_v16   ;;  %3108 = vset.pattern.permute.xlu1 %v3202_v2 }
 0x2b3   :  { %868 = vperm.xlu1 %3108, %v2363_v8  }
 0x2b4   :  { %2690 = vmatmul.mubr.msk.f32.gmra.mrb[14].mxu0 %vm167_vm0, %v2348_v1 }
 0x2b5   :  { %2727 = vmatprep.mubr.msk.f32.mxu0 %vm167_vm0, %v2368_v58 }
 0x2b6   :  { %920 = vperm.xlu0 %3111, %v2364_v17  }
 0x2b7   :  { %3109 = vset.pattern.permute.xlu1 %v3203_v4 }
 0x2b8   :  { %831 = vperm.xlu1 %3109, %v2365_v18  }
 0x2ba   :  { %928 = vperm.xlu0 %3111, %v2366_v19  }
 0x2bc   :  { %836 = vperm.xlu1 %3109, %v2366_v19  }
 0x2be   :  { %3114 = vset.pattern.permute.xlu0 %v3203_v4 }
 0x2c0   :  { %3110 = vset.pattern.permute.xlu1 %v3202_v2 }
 0x2c1   :  { %880 = vperm.xlu1 %3110, %v2366_v19  }
 0x2c5   :  { %3112 = vset.pattern.permute.xlu1 %v3204_v11 }
 0x2c6   :  { %904 = vperm.xlu1 %3112, %v2360_v9  }
 0x2ca   :  { %908 = vperm.xlu1 %3112, %v2361_v13   ;;  %v395_v13 = vadd.f32 %v3366_v12, %v393_v5  ;;  %v2372_v5 = vld [vmem:[%s3790_s1 + $0xb0] sm:$0xff] }
 0x2ce   :  { %916 = vperm.xlu1 %3112, %v2363_v8  }
 0x2d2   :  { %924 = vperm.xlu1 %3112, %v2365_v18  }
 0x2d6   :  { %3113 = vset.pattern.permute.xlu1 %v3208_v10 }
 0x2f1   :  { %v688_v59 = vpop.permute.xlu1 %687 }
 0x312   :  { %v807_v60 = vpop.permute.xlu1 %806 }
 0x313   :  { %v802_v8 = vpop.permute.xlu0 %801 }
 0x318   :  { %v853_v61 = vpop.permute.xlu1 %852 }
 0x31e   :  { %v812_v62 = vpop.permute.xlu1 %811 }
 0x322   :  { %v817_v3 = vpop.permute.xlu1 %816 }
 0x327   :  { %v865_v9 = vpop.permute.xlu1 %864 }
 0x37b   :  { %v2682_v23 = vpop.f32.mrb[8].mxu0 }
 0x37c   :  { %v644_v25 = vadd.f32 %v2682_v23, %v522_v21  ;;  %v638_v27 = vpop.f32.mrb[9].mxu0 }
 0x37d   :  { %v639_v28 = vadd.f32 %v638_v27, %v518_v20  ;;  %v822_v20 = vpop.permute.xlu0 %821 }
 0x37e   :  { %v678_v29 = vmax.f32 %v644_v25, 0.0 }
 0x37f   :  { %v677_v30 = vmax.f32 %v639_v28, 0.0  ;;  %v2685_v31 = vpop.f32.mrb[10].mxu0 }
 0x380   :  { %v654_v32 = vadd.f32 %v2685_v31, %v530_v22  ;;  %v648_v33 = vpop.f32.mrb[11].mxu0  ;;  %v827_v22 = vpop.permute.xlu1 %826 }
 0x381   :  { %v2944_v35 = vpack.c.bf16 %v678_v29, %v677_v30  ;;  %v649_v36 = vadd.f32 %v648_v33, %v526_v24  ;;  %v857_v23 = vpop.permute.xlu0 %856 }
 0x382   :  { %v680_v38 = vmax.f32 %v654_v32, 0.0 }
 0x383   :  { %v679_v39 = vmax.f32 %v649_v36, 0.0  ;;  %v2688_v40 = vpop.f32.mrb[12].mxu0  ;;  %2945 = vmatpush3.bf16.msra.mxu1 %v2944_v35 }
 0x384   :  { %v664_v41 = vadd.f32 %v2688_v40, %v538_v34  ;;  %v658_v42 = vpop.f32.mrb[13].mxu0  ;;  %2946 = vmatprep.subr.bf16.mxu1 %v3205_v6  ;;  %v869_v24 = vpop.permute.xlu1 %868 }
 0x385   :  { %v2947_v43 = vpack.c.bf16 %v680_v38, %v679_v39  ;;  %v659_v44 = vadd.f32 %v658_v42, %v534_v37  ;;  %v861_v28 = vpop.permute.xlu0 %860 }
 0x386   :  { %v682_v45 = vmax.f32 %v664_v41, 0.0 }
 0x387   :  { %v681_v47 = vmax.f32 %v659_v44, 0.0  ;;  %v2691_v48 = vpop.f32.mrb[14].mxu0  ;;  %2948 = vmatpush3.bf16.msra.mxu1 %v2947_v43 }
 0x388   :  { %v674_v50 = vadd.f32 %v2691_v48, %v546_v46  ;;  %v668_v51 = vpop.f32.mrb[15].mxu0  ;;  %2949 = vmatprep.subr.bf16.mxu1 %v3205_v6  ;;  %v832_v31 = vpop.permute.xlu1 %831 }
 0x389   :  { %v2950_v52 = vpack.c.bf16 %v682_v45, %v681_v47  ;;  %v669_v53 = vadd.f32 %v668_v51, %v542_v49  ;;  %v873_v33 = vpop.permute.xlu0 %872 }
 0x38a   :  { %v684_v54 = vmax.f32 %v674_v50, 0.0 }
 0x38b   :  { %v683_v55 = vmax.f32 %v669_v53, 0.0  ;;  %2951 = vmatpush3.bf16.msra.mxu1 %v2950_v52 }
 0x38c   :  { %2952 = vmatprep.subr.bf16.mxu1 %v3205_v6  ;;  %v837_v38 = vpop.permute.xlu1 %836 }
 0x38d   :  { %v2953_v56 = vpack.c.bf16 %v684_v54, %v683_v55  ;;  %v877_v52 = vpop.permute.xlu0 %876 }
 0x38f   :  { %2954 = vmatpush3.bf16.msra.mxu1 %v2953_v56 }
 0x390   :  { %2971 = vmatprep.subr.bf16.mxu1 %v3205_v6  ;;  %v881_v53 = vpop.permute.xlu1 %880 }
 0x392   :  { %2709 = vmatmul.mubr.msk.f32.vlgmr.msra.gmra.mrb[2].mxu1 %vm167_vm0, %v2349_v57 }
 0x393   :  { %2755 = vmatprep.mubr.msk.f32.mxu1 %vm3206_vm1, %v3207_v7 }
 0x465   :  { %v759_v63 = vpop.f32.mrb[2].mxu1 }
 0x466   :  { %v760_v0 = vadd.f32 %v759_v63, %v688_v59  ;;  %v2710_v1 = vpop.f32.mrb[3].mxu1 }
 0x467   :  { %v2370_v1 = vld [vmem:[%s3790_s1 + $0xa0] sm:$0xff] }
 0x468   :  { %3158 = vtanh.f32 %v760_v0  ;;  %v771_v30 = vrot.slane %v760_v0, 3  ;;  %v2369_v0 = vld [vmem:[%s3790_s1 + $0x98] sm:$0xff] }
 0x472   :  { %v3159_v16 = vpop.eup %3158 }
 0x473   :  { %v764_v17 = vmul.f32 1.442695, %v3159_v16  ;;  %v774_v18 = vadd.f32 %v3159_v16, %v395_v13  ;;  %v776_v19 = vrot.slane %v3159_v16, 1  ;;  %v2375_v13 = vld [vmem:[%s3790_s1 + $0xc8] sm:$0xff]  ;;  %v2367_v16 = vld [vmem:[%s3791_s2 + $0x80] sm:$0xf] }
 0x474   :  { %1070 = vperm.xlu1 %3113, %v2367_v16  }
 0x475   :  { %3160 = vpow2.f32 %v764_v17  ;;  %v3460_v21 = vadd.f32 %v776_v19, %v774_v18  ;;  %v2386_v17 = vld [vmem:[%s3791_s2 + $0xc0] sm:$0xff]  ;;  %v2387_v19 = vld [vmem:[%s3791_s2 + $0xc8] sm:$0xff] }
 0x476   :  { %1181 = vperm.xlu0 %3114, %v2386_v17   ;;  %v2390_v18 = vld [vmem:[%s3791_s2 + $0xe0] sm:$0xff] }
 0x478   :  { %3115 = vset.pattern.permute.xlu1 %v3203_v4 }
 0x479   :  { %1186 = vperm.xlu1 %3115, %v2387_v19  }
 0x47a   :  { %1201 = vperm.xlu0 %3114, %v2390_v18  }
 0x47d   :  { %3116 = vset.pattern.permute.xlu1 %v3202_v2 }
 0x47e   :  { %3119 = vset.pattern.permute.xlu0 %v3202_v2  ;;  %1232 = vperm.xlu1 %3116, %v2386_v17  }
 0x47f   :  { %v3161_v25 = vpop.eup %3160  ;;  %1236 = vperm.xlu0 %3119, %v2387_v19  }
 0x480   :  { %v767_v27 = vrot.slane %v3161_v25, 1  ;;  %v2393_v25 = vld [vmem:[%s3791_s2 + $0xf8] sm:$0xff] }
 0x482   :  { %v769_v29 = vmul.f32 %v767_v27, %v3276_v15  ;;  %3117 = vset.pattern.permute.xlu1 %v3203_v4  ;;  %v901_v27 = vpop.permute.xlu0 %900 }
 0x484   :  { %v3463_v32 = vadd.f32 %v771_v30, %v769_v29 }
 0x486   :  { %v842_v12 = vrot.slane %v3463_v32, %v3271_v14  ;;  %v913_v29 = vpop.permute.xlu0 %912 }
 0x488   :  { %v845_v34 = vmul.f32 %v842_v12, %v812_v62  ;;  %v846_v35 = vmul.f32 %v842_v12, %v817_v3  ;;  %v843_v36 = vmul.f32 %v842_v12, %v802_v8  ;;  %v847_v37 = vmul.f32 %v842_v12, %v822_v20  ;;  %v2371_v3 = vld [vmem:[%s3790_s1 + $0xa8] sm:$0xff]  ;;  %v2373_v8 = vld [vmem:[%s3790_s1 + $0xb8] sm:$0xff]  ;;  %v2388_v20 = vld [vmem:[%s3791_s2 + $0xd0] sm:$0xff] }
 0x489   :  { %v848_v39 = vmul.f32 %v842_v12, %v827_v22  ;;  %v844_v40 = vmul.f32 %v842_v12, %v807_v60  ;;  %v849_v46 = vmul.f32 %v842_v12, %v832_v31  ;;  %v850_v47 = vmul.f32 %v842_v12, %v837_v38  ;;  %1240 = vperm.xlu0 %3119, %v2388_v20   ;;  %v2389_v22 = vld [vmem:[%s3791_s2 + $0xd8] sm:$0xff] }
 0x48a   :  { %v883_v41 = vadd.f32 %v853_v61, %v843_v36  ;;  %v886_v42 = vadd.f32 %v865_v9, %v846_v35  ;;  %v885_v43 = vadd.f32 %v861_v28, %v845_v34  ;;  %v887_v45 = vadd.f32 %v869_v24, %v847_v37  ;;  %v2374_v9 = vld [vmem:[%s3790_s1 + $0xc0] sm:$0xff]  ;;  %1191 = vperm.xlu1 %3117, %v2388_v20   ;;  %v2392_v24 = vld [vmem:[%s3791_s2 + $0xf0] sm:$0xff]  ;;  %v905_v28 = vpop.permute.xlu1 %904 }
 0x48b   :  { %v884_v44 = vadd.f32 %v857_v23, %v844_v40  ;;  %v888_v51 = vadd.f32 %v873_v33, %v848_v39  ;;  %v889_v55 = vadd.f32 %v877_v52, %v849_v46  ;;  %v890_v59 = vadd.f32 %v881_v53, %v850_v47  ;;  %v2391_v23 = vld [vmem:[%s3791_s2 + $0xe8] sm:$0xff]  ;;  %v921_v40 = vpop.permute.xlu0 %920 }
 0x48c   :  { %v891_v15 = vmax.f32 %v883_v41, 0.0  ;;  %v894_v48 = vmax.f32 %v886_v42, 0.0  ;;  %v893_v50 = vmax.f32 %v885_v43, 0.0  ;;  %v895_v56 = vmax.f32 %v887_v45, 0.0 }
 0x48d   :  { %v892_v49 = vmax.f32 %v884_v44, 0.0  ;;  %v896_v58 = vmax.f32 %v888_v51, 0.0  ;;  %v897_v61 = vmax.f32 %v889_v55, 0.0  ;;  %v898_v62 = vmax.f32 %v890_v59, 0.0  ;;  %1252 = vperm.xlu0 %3119, %v2391_v23  }
 0x48e   :  { %v2959_v57 = vpack.c.bf16 %v894_v48, %v893_v50  ;;  %1196 = vperm.xlu1 %3117, %v2389_v22   ;;  %v909_v31 = vpop.permute.xlu1 %908 }
 0x48f   :  { %v2955_v54 = vpack.c.bf16 %v892_v49, %v891_v15  ;;  %v2963_v60 = vpack.c.bf16 %v896_v58, %v895_v56  ;;  %v2967_v63 = vpack.c.bf16 %v898_v62, %v897_v61  ;;  %v929_v51 = vpop.permute.xlu0 %928  ;;  %v2376_v62 = vld [vmem:[%s3790_s1 + $0xd0] sm:$0xf] }
 0x491   :  { %2956 = vmatprep.subr.bf16.mxu0 %v2955_v54  ;;  %1256 = vperm.xlu0 %3119, %v2392_v24  }
 0x492   :  { %2958 = vmatpush3.bf16.msra.mxu0 %v2955_v54  ;;  %3118 = vset.pattern.permute.xlu1 %v3202_v2  ;;  %v917_v43 = vpop.permute.xlu1 %916 }
 0x493   :  { %2960 = vmatprep.subr.bf16.mxu0 %v2959_v57  ;;  %1244 = vperm.xlu1 %3118, %v2389_v22  }
 0x495   :  { %3124 = vset.pattern.permute.xlu0 %v3204_v11 }
 0x496   :  { %2962 = vmatpush3.bf16.msra.mxu0 %v2959_v57  ;;  %1280 = vperm.xlu0 %3124, %v2386_v17   ;;  %v925_v54 = vpop.permute.xlu1 %924 }
 0x497   :  { %2964 = vmatprep.subr.bf16.mxu0 %v2963_v60  ;;  %3120 = vset.pattern.permute.xlu1 %v3203_v4 }
 0x498   :  { %1206 = vperm.xlu1 %3120, %v2391_v23  }
 0x49a   :  { %2966 = vmatpush3.bf16.msra.mxu0 %v2963_v60  ;;  %1292 = vperm.xlu0 %3124, %v2389_v22  }
 0x49b   :  { %2968 = vmatprep.subr.bf16.mxu0 %v2967_v63 }
 0x49c   :  { %3121 = vset.pattern.permute.xlu1 %v3202_v2 }
 0x49d   :  { %1248 = vperm.xlu1 %3121, %v2390_v18  }
 0x49e   :  { %2970 = vmatpush3.bf16.msra.mxu0 %v2967_v63  ;;  %1300 = vperm.xlu0 %3124, %v2391_v23   ;;  %v2395_v63 = vld [vmem:[%s3790_s1 + $0xd8] sm:$0xff] }
 0x4a1   :  { %2728 = vmatmul.mubr.msk.f32.vlgmr.msra.gmra.mrb[16].mxu0 %vm167_vm0, %v2369_v0  ;;  %3122 = vset.pattern.permute.xlu1 %v3203_v4 }
 0x4a2   :  { %2730 = vmatprep.mubr.msk.f32.mxu0 %vm167_vm0, %v2370_v1  ;;  %1308 = vperm.xlu0 %3124, %v2393_v25  }
 0x4a3   :  { %1211 = vperm.xlu1 %3122, %v2392_v24  }
 0x4a5   :  { %2731 = vmatmul.mubr.msk.f32.gmra.mrb[18].mxu0 %vm167_vm0, %v2371_v3 }
 0x4a6   :  { %2733 = vmatprep.mubr.msk.f32.mxu0 %vm167_vm0, %v2372_v5  ;;  %3127 = vset.pattern.permute.xlu0 %v3203_v4 }
 0x4a7   :  { %1216 = vperm.xlu1 %3122, %v2393_v25  }
 0x4a9   :  { %2734 = vmatmul.mubr.msk.f32.gmra.mrb[20].mxu0 %vm167_vm0, %v2373_v8 }
 0x4aa   :  { %2736 = vmatprep.mubr.msk.f32.mxu0 %vm167_vm0, %v2374_v9 }
 0x4ab   :  { %3123 = vset.pattern.permute.xlu1 %v3202_v2 }
 0x4ac   :  { %1260 = vperm.xlu1 %3123, %v2393_v25  }
 0x4ad   :  { %2737 = vmatmul.mubr.msk.f32.gmra.mrb[22].mxu0 %vm167_vm0, %v2375_v13 }
 0x4ae   :  { %2774 = vmatprep.mubr.msk.f32.mxu0 %vm167_vm0, %v2395_v63 }
 0x4b0   :  { %3125 = vset.pattern.permute.xlu1 %v3204_v11 }
 0x4b1   :  { %1284 = vperm.xlu1 %3125, %v2387_v19  }
 0x4b5   :  { %1288 = vperm.xlu1 %3125, %v2388_v20  }
 0x4b9   :  { %1296 = vperm.xlu1 %3125, %v2390_v18  }
 0x4bd   :  { %1304 = vperm.xlu1 %3125, %v2392_v24  }
 0x4c1   :  { %3126 = vset.pattern.permute.xlu1 %v3208_v10 }
 0x4f3   :  { %v1071_v0 = vpop.permute.xlu1 %1070 }
 0x4f5   :  { %v1182_v17 = vpop.permute.xlu0 %1181 }
 0x4f8   :  { %v1187_v1 = vpop.permute.xlu1 %1186 }
 0x4f9   :  { %v1202_v22 = vpop.permute.xlu0 %1201 }
 0x4fd   :  { %v1233_v3 = vpop.permute.xlu1 %1232 }
 0x509   :  { %v1192_v5 = vpop.permute.xlu1 %1191 }
 0x50d   :  { %v1197_v16 = vpop.permute.xlu1 %1196 }
 0x512   :  { %v1245_v18 = vpop.permute.xlu1 %1244 }
 0x517   :  { %v1207_v25 = vpop.permute.xlu1 %1206 }
 0x574   :  { %v2729_v30 = vpop.f32.mrb[16].mxu0 }
 0x575   :  { %v1027_v12 = vadd.f32 %v2729_v30, %v905_v28  ;;  %v1021_v33 = vpop.f32.mrb[17].mxu0  ;;  %v1237_v28 = vpop.permute.xlu0 %1236 }
 0x576   :  { %v1022_v34 = vadd.f32 %v1021_v33, %v901_v27 }
 0x577   :  { %v1061_v35 = vmax.f32 %v1027_v12, 0.0 }
 0x578   :  { %v1060_v36 = vmax.f32 %v1022_v34, 0.0  ;;  %v2732_v37 = vpop.f32.mrb[18].mxu0 }
 0x579   :  { %v1037_v38 = vadd.f32 %v2732_v37, %v913_v29  ;;  %v1031_v39 = vpop.f32.mrb[19].mxu0  ;;  %v1249_v29 = vpop.permute.xlu1 %1248 }
 0x57a   :  { %v2972_v41 = vpack.c.bf16 %v1061_v35, %v1060_v36  ;;  %v1032_v42 = vadd.f32 %v1031_v39, %v909_v31  ;;  %v1241_v31 = vpop.permute.xlu0 %1240 }
 0x57b   :  { %v1063_v44 = vmax.f32 %v1037_v38, 0.0 }
 0x57c   :  { %v1062_v15 = vmax.f32 %v1032_v42, 0.0  ;;  %v2735_v45 = vpop.f32.mrb[20].mxu0  ;;  %2973 = vmatpush3.bf16.msra.mxu1 %v2972_v41 }
 0x57d   :  { %v1047_v46 = vadd.f32 %v2735_v45, %v921_v40  ;;  %v1041_v47 = vpop.f32.mrb[21].mxu0  ;;  %2974 = vmatprep.subr.bf16.mxu1 %v3205_v6  ;;  %v1212_v34 = vpop.permute.xlu1 %1211 }
 0x57e   :  { %v2975_v48 = vpack.c.bf16 %v1063_v44, %v1062_v15  ;;  %v1042_v49 = vadd.f32 %v1041_v47, %v917_v43  ;;  %v1253_v37 = vpop.permute.xlu0 %1252 }
 0x57f   :  { %v1065_v50 = vmax.f32 %v1047_v46, 0.0 }
 0x580   :  { %v1064_v52 = vmax.f32 %v1042_v49, 0.0  ;;  %v2738_v53 = vpop.f32.mrb[22].mxu0  ;;  %2976 = vmatpush3.bf16.msra.mxu1 %v2975_v48 }
 0x581   :  { %v1057_v55 = vadd.f32 %v2738_v53, %v929_v51  ;;  %v1051_v56 = vpop.f32.mrb[23].mxu0  ;;  %2977 = vmatprep.subr.bf16.mxu1 %v3205_v6  ;;  %v1217_v41 = vpop.permute.xlu1 %1216 }
 0x582   :  { %v2978_v57 = vpack.c.bf16 %v1065_v50, %v1064_v52  ;;  %v1052_v58 = vadd.f32 %v1051_v56, %v925_v54  ;;  %v1257_v54 = vpop.permute.xlu0 %1256 }
 0x583   :  { %v1067_v59 = vmax.f32 %v1057_v55, 0.0 }
 0x584   :  { %v1066_v60 = vmax.f32 %v1052_v58, 0.0  ;;  %2979 = vmatpush3.bf16.msra.mxu1 %v2978_v57 }
 0x585   :  { %2980 = vmatprep.subr.bf16.mxu1 %v3205_v6  ;;  %v1261_v55 = vpop.permute.xlu1 %1260 }
 0x586   :  { %v2981_v61 = vpack.c.bf16 %v1067_v59, %v1066_v60 }
 0x588   :  { %2982 = vmatpush3.bf16.msra.mxu1 %v2981_v61 }
 0x589   :  { %2999 = vmatprep.subr.bf16.mxu1 %v3205_v6 }
 0x58b   :  { %2756 = vmatmul.mubr.msk.f32.vlgmr.msra.gmra.mrb[4].mxu1 %vm167_vm0, %v2376_v62 }
 0x58c   :  { %2802 = vmatprep.mubr.msk.f32.mxu1 %vm3206_vm1, %v3207_v7 }
 0x65e   :  { %v1142_v8 = vpop.f32.mrb[4].mxu1 }
 0x65f   :  { %v1143_v9 = vadd.f32 %v1142_v8, %v1071_v0  ;;  %v2757_v13 = vpop.f32.mrb[5].mxu1  ;;  %v2398_v8 = vld [vmem:[%s3790_s1 + $0xf0] sm:$0xff] }
 0x660   :  { %v2400_v13 = vld [vmem:[%s3790_s1 + $0x100] sm:$0xff] }
 0x661   :  { %3162 = vtanh.f32 %v1143_v9  ;;  %v1151_v33 = vrot.slane %v1143_v9, 2  ;;  %v2399_v9 = vld [vmem:[%s3790_s1 + $0xf8] sm:$0xff] }
 0x66b   :  { %v3163_v19 = vpop.eup %3162 }
 0x66c   :  { %v1147_v20 = vmul.f32 1.442695, %v3163_v19  ;;  %v1154_v23 = vadd.f32 %v3163_v19, %v3460_v21  ;;  %v1156_v24 = vrot.slane %v3163_v19, 1  ;;  %v2413_v19 = vld [vmem:[%s3791_s2 + $0x100] sm:$0xff] }
 0x66d   :  { %1564 = vperm.xlu0 %3127, %v2413_v19  }
 0x66e   :  { %3164 = vpow2.f32 %v1147_v20  ;;  %v3550_v27 = vadd.f32 %v1156_v24, %v1154_v23  ;;  %v2417_v20 = vld [vmem:[%s3791_s2 + $0x120] sm:$0xff]  ;;  %v2415_v23 = vld [vmem:[%s3791_s2 + $0x110] sm:$0xff]  ;;  %v2416_v24 = vld [vmem:[%s3791_s2 + $0x118] sm:$0xff] }
 0x671   :  { %1584 = vperm.xlu0 %3127, %v2417_v20  }
 0x675   :  { %3132 = vset.pattern.permute.xlu0 %v3202_v2 }
 0x678   :  { %v3165_v30 = vpop.eup %3164 }
 0x679   :  { %v1149_v12 = vmul.f32 %v3165_v30, %v3372_v26  ;;  %v1281_v30 = vpop.permute.xlu0 %1280 }
 0x67b   :  { %v3553_v35 = vadd.f32 %v1151_v33, %v1149_v12 }
 0x67d   :  { %v1222_v36 = vrot.slane %v3553_v35, %v3271_v14  ;;  %v1293_v12 = vpop.permute.xlu0 %1292 }
 0x67f   :  { %v1225_v21 = vmul.f32 %v1222_v36, %v1192_v5  ;;  %v1226_v38 = vmul.f32 %v1222_v36, %v1197_v16  ;;  %v1223_v39 = vmul.f32 %v1222_v36, %v1182_v17  ;;  %v1227_v40 = vmul.f32 %v1222_v36, %v1202_v22  ;;  %v2397_v5 = vld [vmem:[%s3790_s1 + $0xe8] sm:$0xff]  ;;  %v2402_v17 = vld [vmem:[%s3790_s1 + $0x110] sm:$0xff] }
 0x680   :  { %v1228_v42 = vmul.f32 %v1222_v36, %v1207_v25  ;;  %v1224_v43 = vmul.f32 %v1222_v36, %v1187_v1  ;;  %v1229_v48 = vmul.f32 %v1222_v36, %v1212_v34  ;;  %v1230_v49 = vmul.f32 %v1222_v36, %v1217_v41  ;;  %v2401_v16 = vld [vmem:[%s3790_s1 + $0x108] sm:$0xff] }
 0x681   :  { %v1263_v44 = vadd.f32 %v1233_v3, %v1223_v39  ;;  %v1266_v15 = vadd.f32 %v1245_v18, %v1226_v38  ;;  %v1265_v45 = vadd.f32 %v1241_v31, %v1225_v21  ;;  %v1267_v47 = vadd.f32 %v1249_v29, %v1227_v40  ;;  %v2396_v3 = vld [vmem:[%s3790_s1 + $0xe0] sm:$0xff]  ;;  %v2414_v22 = vld [vmem:[%s3791_s2 + $0x108] sm:$0xff]  ;;  %v2420_v29 = vld [vmem:[%s3791_s2 + $0x138] sm:$0xff]  ;;  %v1285_v31 = vpop.permute.xlu1 %1284 }
 0x682   :  { %v1264_v46 = vadd.f32 %v1237_v28, %v1224_v43  ;;  %v1268_v53 = vadd.f32 %v1253_v37, %v1228_v42  ;;  %v1269_v57 = vadd.f32 %v1257_v54, %v1229_v48  ;;  %v1270_v61 = vadd.f32 %v1261_v55, %v1230_v49  ;;  %v2394_v18 = vld [vmem:[%s3791_s2 + $0xc0] sm:$0xf]  ;;  %1619 = vperm.xlu0 %3132, %v2414_v22   ;;  %v2418_v25 = vld [vmem:[%s3791_s2 + $0x128] sm:$0xff]  ;;  %v2419_v28 = vld [vmem:[%s3791_s2 + $0x130] sm:$0xff]  ;;  %v1301_v43 = vpop.permute.xlu0 %1300 }
 0x683   :  { %v1271_v26 = vmax.f32 %v1263_v44, 0.0  ;;  %v1274_v50 = vmax.f32 %v1266_v15, 0.0  ;;  %v1273_v52 = vmax.f32 %v1265_v45, 0.0  ;;  %v1275_v58 = vmax.f32 %v1267_v47, 0.0  ;;  %1450 = vperm.xlu1 %3126, %v2394_v18  }
 0x684   :  { %v1272_v51 = vmax.f32 %v1264_v46, 0.0  ;;  %v1276_v60 = vmax.f32 %v1268_v53, 0.0  ;;  %v1277_v63 = vmax.f32 %v1269_v57, 0.0  ;;  %v1278_v0 = vmax.f32 %v1270_v61, 0.0 }
 0x685   :  { %v2987_v59 = vpack.c.bf16 %v1274_v50, %v1273_v52  ;;  %v1289_v34 = vpop.permute.xlu1 %1288 }
 0x686   :  { %v2983_v56 = vpack.c.bf16 %v1272_v51, %v1271_v26  ;;  %v2991_v62 = vpack.c.bf16 %v1276_v60, %v1275_v58  ;;  %v2995_v1 = vpack.c.bf16 %v1278_v0, %v1277_v63  ;;  %1623 = vperm.xlu0 %3132, %v2415_v23   ;;  %v1309_v53 = vpop.permute.xlu0 %1308  ;;  %v2403_v0 = vld [vmem:[%s3790_s1 + $0x118] sm:$0xf] }
 0x687   :  { %3128 = vset.pattern.permute.xlu1 %v3203_v4 }
 0x688   :  { %2984 = vmatprep.subr.bf16.mxu0 %v2983_v56  ;;  %1569 = vperm.xlu1 %3128, %v2414_v22  }
 0x689   :  { %2986 = vmatpush3.bf16.msra.mxu0 %v2983_v56  ;;  %v1297_v45 = vpop.permute.xlu1 %1296 }
 0x68a   :  { %2988 = vmatprep.subr.bf16.mxu0 %v2987_v59  ;;  %1635 = vperm.xlu0 %3132, %v2418_v25  }
 0x68c   :  { %3129 = vset.pattern.permute.xlu1 %v3202_v2 }
 0x68d   :  { %2990 = vmatpush3.bf16.msra.mxu0 %v2987_v59  ;;  %1615 = vperm.xlu1 %3129, %v2413_v19   ;;  %v1305_v56 = vpop.permute.xlu1 %1304 }
 0x68e   :  { %2992 = vmatprep.subr.bf16.mxu0 %v2991_v62  ;;  %1639 = vperm.xlu0 %3132, %v2419_v28  }
 0x691   :  { %2994 = vmatpush3.bf16.msra.mxu0 %v2991_v62  ;;  %3130 = vset.pattern.permute.xlu1 %v3203_v4 }
 0x692   :  { %2996 = vmatprep.subr.bf16.mxu0 %v2995_v1  ;;  %1574 = vperm.xlu1 %3130, %v2415_v23  }
 0x693   :  { %3137 = vset.pattern.permute.xlu0 %v3204_v11 }
 0x694   :  { %1663 = vperm.xlu0 %3137, %v2413_v19  }
 0x695   :  { %2998 = vmatpush3.bf16.msra.mxu0 %v2995_v1  ;;  %v2422_v1 = vld [vmem:[%s3790_s1 + $0x120] sm:$0xff] }
 0x696   :  { %1579 = vperm.xlu1 %3130, %v2416_v24  }
 0x698   :  { %2775 = vmatmul.mubr.msk.f32.vlgmr.msra.gmra.mrb[24].mxu0 %vm167_vm0, %v2396_v3  ;;  %1675 = vperm.xlu0 %3137, %v2416_v24  }
 0x699   :  { %2777 = vmatprep.mubr.msk.f32.mxu0 %vm167_vm0, %v2397_v5 }
 0x69a   :  { %3131 = vset.pattern.permute.xlu1 %v3202_v2 }
 0x69b   :  { %1627 = vperm.xlu1 %3131, %v2416_v24  }
 0x69c   :  { %2778 = vmatmul.mubr.msk.f32.gmra.mrb[26].mxu0 %vm167_vm0, %v2398_v8  ;;  %1683 = vperm.xlu0 %3137, %v2418_v25  }
 0x69d   :  { %2780 = vmatprep.mubr.msk.f32.mxu0 %vm167_vm0, %v2399_v9 }
 0x69f   :  { %3133 = vset.pattern.permute.xlu1 %v3203_v4 }
 0x6a0   :  { %2781 = vmatmul.mubr.msk.f32.gmra.mrb[28].mxu0 %vm167_vm0, %v2400_v13  ;;  %1589 = vperm.xlu1 %3133, %v2418_v25  }
 0x6a1   :  { %2783 = vmatprep.mubr.msk.f32.mxu0 %vm167_vm0, %v2401_v16  ;;  %1691 = vperm.xlu0 %3137, %v2420_v29  }
 0x6a4   :  { %2784 = vmatmul.mubr.msk.f32.gmra.mrb[30].mxu0 %vm167_vm0, %v2402_v17  ;;  %3134 = vset.pattern.permute.xlu1 %v3202_v2 }
 0x6a5   :  { %1631 = vperm.xlu1 %3134, %v2417_v20   ;;  %3140 = vset.pattern.permute.xlu0 %v3203_v4 }
 0x6a6   :  { %2821 = vmatprep.mubr.msk.f32.mxu0 %vm167_vm0, %v2422_v1 }
 0x6a9   :  { %3135 = vset.pattern.permute.xlu1 %v3203_v4 }
 0x6aa   :  { %1594 = vperm.xlu1 %3135, %v2419_v28  }
 0x6ae   :  { %1599 = vperm.xlu1 %3135, %v2420_v29  }
 0x6b2   :  { %3136 = vset.pattern.permute.xlu1 %v3202_v2 }
 0x6b3   :  { %1643 = vperm.xlu1 %3136, %v2420_v29  }
 0x6b7   :  { %3138 = vset.pattern.permute.xlu1 %v3204_v11 }
 0x6b8   :  { %1667 = vperm.xlu1 %3138, %v2414_v22  }
 0x6bc   :  { %1671 = vperm.xlu1 %3138, %v2415_v23  }
 0x6c0   :  { %1679 = vperm.xlu1 %3138, %v2417_v20  }
 0x6c4   :  { %1687 = vperm.xlu1 %3138, %v2419_v28  }
 0x6c8   :  { %3139 = vset.pattern.permute.xlu1 %v3208_v10 }
 0x6ec   :  { %v1565_v19 = vpop.permute.xlu0 %1564 }
 0x6f0   :  { %v1585_v28 = vpop.permute.xlu0 %1584 }
 0x702   :  { %v1451_v3 = vpop.permute.xlu1 %1450 }
 0x707   :  { %v1570_v5 = vpop.permute.xlu1 %1569 }
 0x70c   :  { %v1616_v8 = vpop.permute.xlu1 %1615 }
 0x711   :  { %v1575_v9 = vpop.permute.xlu1 %1574 }
 0x715   :  { %v1580_v18 = vpop.permute.xlu1 %1579 }
 0x71a   :  { %v1628_v20 = vpop.permute.xlu1 %1627 }
 0x76b   :  { %v2776_v33 = vpop.f32.mrb[24].mxu0 }
 0x76c   :  { %v1407_v36 = vadd.f32 %v2776_v33, %v1285_v31  ;;  %v1401_v37 = vpop.f32.mrb[25].mxu0  ;;  %v1620_v31 = vpop.permute.xlu0 %1619 }
 0x76d   :  { %v1402_v21 = vadd.f32 %v1401_v37, %v1281_v30  ;;  %v1590_v30 = vpop.permute.xlu1 %1589 }
 0x76e   :  { %v1441_v38 = vmax.f32 %v1407_v36, 0.0 }
 0x76f   :  { %v1440_v39 = vmax.f32 %v1402_v21, 0.0  ;;  %v2779_v40 = vpop.f32.mrb[26].mxu0 }
 0x770   :  { %v1417_v41 = vadd.f32 %v2779_v40, %v1293_v12  ;;  %v1411_v42 = vpop.f32.mrb[27].mxu0  ;;  %v1624_v36 = vpop.permute.xlu0 %1623 }
 0x771   :  { %v3000_v44 = vpack.c.bf16 %v1441_v38, %v1440_v39  ;;  %v1412_v15 = vadd.f32 %v1411_v42, %v1289_v34  ;;  %v1632_v12 = vpop.permute.xlu1 %1631 }
 0x772   :  { %v1443_v46 = vmax.f32 %v1417_v41, 0.0 }
 0x773   :  { %v1442_v26 = vmax.f32 %v1412_v15, 0.0  ;;  %v2782_v47 = vpop.f32.mrb[28].mxu0  ;;  %3001 = vmatpush3.bf16.msra.mxu1 %v3000_v44 }
 0x774   :  { %v1427_v48 = vadd.f32 %v2782_v47, %v1301_v43  ;;  %v1421_v49 = vpop.f32.mrb[29].mxu0  ;;  %3002 = vmatprep.subr.bf16.mxu1 %v3205_v6  ;;  %v1636_v40 = vpop.permute.xlu0 %1635 }
 0x775   :  { %v3003_v50 = vpack.c.bf16 %v1443_v46, %v1442_v26  ;;  %v1422_v51 = vadd.f32 %v1421_v49, %v1297_v45  ;;  %v1595_v38 = vpop.permute.xlu1 %1594 }
 0x776   :  { %v1445_v52 = vmax.f32 %v1427_v48, 0.0 }
 0x777   :  { %v1444_v54 = vmax.f32 %v1422_v51, 0.0  ;;  %v2785_v55 = vpop.f32.mrb[30].mxu0  ;;  %3004 = vmatpush3.bf16.msra.mxu1 %v3003_v50 }
 0x778   :  { %v1437_v57 = vadd.f32 %v2785_v55, %v1309_v53  ;;  %v1431_v58 = vpop.f32.mrb[31].mxu0  ;;  %3005 = vmatprep.subr.bf16.mxu1 %v3205_v6 }
 0x779   :  { %v3006_v59 = vpack.c.bf16 %v1445_v52, %v1444_v54  ;;  %v1432_v60 = vadd.f32 %v1431_v58, %v1305_v56  ;;  %v1600_v15 = vpop.permute.xlu1 %1599 }
 0x77a   :  { %v1447_v61 = vmax.f32 %v1437_v57, 0.0  ;;  %v1640_v57 = vpop.permute.xlu0 %1639 }
 0x77b   :  { %v1446_v62 = vmax.f32 %v1432_v60, 0.0  ;;  %3007 = vmatpush3.bf16.msra.mxu1 %v3006_v59 }
 0x77c   :  { %3008 = vmatprep.subr.bf16.mxu1 %v3205_v6 }
 0x77d   :  { %v3009_v63 = vpack.c.bf16 %v1447_v61, %v1446_v62  ;;  %v1644_v58 = vpop.permute.xlu1 %1643 }
 0x77f   :  { %3010 = vmatpush3.bf16.msra.mxu1 %v3009_v63 }
 0x780   :  { %3027 = vmatprep.subr.bf16.mxu1 %v3205_v6 }
 0x782   :  { %2803 = vmatmul.mubr.msk.f32.vlgmr.msra.gmra.mrb[6].mxu1 %vm167_vm0, %v2403_v0 }
 0x783   :  { %2849 = vmatprep.mubr.msk.f32.mxu1 %vm3206_vm1, %v3207_v7 }
 0x855   :  { %v1522_v13 = vpop.f32.mrb[6].mxu1 }
 0x856   :  { %v1523_v16 = vadd.f32 %v1522_v13, %v1451_v3  ;;  %v2804_v17 = vpop.f32.mrb[7].mxu1  ;;  %v2424_v13 = vld [vmem:[%s3790_s1 + $0x130] sm:$0xff] }
 0x857   :  { %v2426_v17 = vld [vmem:[%s3790_s1 + $0x140] sm:$0xff] }
 0x858   :  { %3166 = vtanh.f32 %v1523_v16  ;;  %v1534_v21 = vrot.slane %v1523_v16, 3  ;;  %v2425_v16 = vld [vmem:[%s3790_s1 + $0x138] sm:$0xff] }
 0x862   :  { %v3167_v22 = vpop.eup %3166 }
 0x863   :  { %v1527_v23 = vmul.f32 1.442695, %v3167_v22  ;;  %v1537_v24 = vadd.f32 %v3167_v22, %v3550_v27  ;;  %v1539_v25 = vrot.slane %v3167_v22, 1  ;;  %v2421_v22 = vld [vmem:[%s3791_s2 + $0x100] sm:$0xf] }
 0x864   :  { %1833 = vperm.xlu1 %3139, %v2421_v22  }
 0x865   :  { %3168 = vpow2.f32 %v1527_v23  ;;  %v3640_v29 = vadd.f32 %v1539_v25, %v1537_v24  ;;  %v2440_v23 = vld [vmem:[%s3791_s2 + $0x140] sm:$0xff]  ;;  %v2441_v25 = vld [vmem:[%s3791_s2 + $0x148] sm:$0xff] }
 0x866   :  { %1944 = vperm.xlu0 %3140, %v2440_v23   ;;  %v2444_v24 = vld [vmem:[%s3791_s2 + $0x160] sm:$0xff] }
 0x868   :  { %3141 = vset.pattern.permute.xlu1 %v3203_v4 }
 0x869   :  { %1949 = vperm.xlu1 %3141, %v2441_v25  }
 0x86a   :  { %1964 = vperm.xlu0 %3140, %v2444_v24  }
 0x86d   :  { %3142 = vset.pattern.permute.xlu1 %v3202_v2 }
 0x86e   :  { %3145 = vset.pattern.permute.xlu0 %v3202_v2  ;;  %1995 = vperm.xlu1 %3142, %v2440_v23  }
 0x86f   :  { %v3169_v33 = vpop.eup %3168  ;;  %1999 = vperm.xlu0 %3145, %v2441_v25  }
 0x870   :  { %v1530_v34 = vrot.slane %v3169_v33, 1  ;;  %v2447_v33 = vld [vmem:[%s3791_s2 + $0x178] sm:$0xff] }
 0x872   :  { %v1532_v37 = vmul.f32 %v1530_v34, %v3463_v32  ;;  %3143 = vset.pattern.permute.xlu1 %v3203_v4  ;;  %v1664_v34 = vpop.permute.xlu0 %1663 }
 0x874   :  { %v3643_v39 = vadd.f32 %v1534_v21, %v1532_v37 }
 0x876   :  { %v1605_v27 = vrot.slane %v3643_v39, %v3271_v14  ;;  %v1676_v37 = vpop.permute.xlu0 %1675 }
 0x878   :  { %v1608_v41 = vmul.f32 %v1605_v27, %v1575_v9  ;;  %v1609_v42 = vmul.f32 %v1605_v27, %v1580_v18  ;;  %v1606_v43 = vmul.f32 %v1605_v27, %v1565_v19  ;;  %v1610_v44 = vmul.f32 %v1605_v27, %v1585_v28  ;;  %v2423_v9 = vld [vmem:[%s3790_s1 + $0x128] sm:$0xff]  ;;  %v2428_v19 = vld [vmem:[%s3790_s1 + $0x150] sm:$0xff] }
 0x879   :  { %v1611_v45 = vmul.f32 %v1605_v27, %v1590_v30  ;;  %v1607_v46 = vmul.f32 %v1605_v27, %v1570_v5  ;;  %v1612_v51 = vmul.f32 %v1605_v27, %v1595_v38  ;;  %v1613_v52 = vmul.f32 %v1605_v27, %v1600_v15  ;;  %v2427_v18 = vld [vmem:[%s3790_s1 + $0x148] sm:$0xff]  ;;  %v2442_v28 = vld [vmem:[%s3791_s2 + $0x150] sm:$0xff]  ;;  %v2443_v30 = vld [vmem:[%s3791_s2 + $0x158] sm:$0xff] }
 0x87a   :  { %v1646_v26 = vadd.f32 %v1616_v8, %v1606_v43  ;;  %v1649_v47 = vadd.f32 %v1628_v20, %v1609_v42  ;;  %v1648_v48 = vadd.f32 %v1624_v36, %v1608_v41  ;;  %v1650_v50 = vadd.f32 %v1632_v12, %v1610_v44  ;;  %v2429_v20 = vld [vmem:[%s3790_s1 + $0x158] sm:$0xff]  ;;  %2003 = vperm.xlu0 %3145, %v2442_v28   ;;  %v2446_v12 = vld [vmem:[%s3791_s2 + $0x170] sm:$0xff]  ;;  %v1668_v36 = vpop.permute.xlu1 %1667 }
 0x87b   :  { %v1647_v49 = vadd.f32 %v1620_v31, %v1607_v46  ;;  %v1651_v56 = vadd.f32 %v1636_v40, %v1611_v45  ;;  %v1652_v60 = vadd.f32 %v1640_v57, %v1612_v51  ;;  %v1653_v0 = vadd.f32 %v1644_v58, %v1613_v52  ;;  %1954 = vperm.xlu1 %3143, %v2442_v28   ;;  %v2445_v31 = vld [vmem:[%s3791_s2 + $0x168] sm:$0xff] }
 0x87c   :  { %v1654_v32 = vmax.f32 %v1646_v26, 0.0  ;;  %v1657_v53 = vmax.f32 %v1649_v47, 0.0  ;;  %v1656_v55 = vmax.f32 %v1648_v48, 0.0  ;;  %v1658_v61 = vmax.f32 %v1650_v50, 0.0 }
 0x87d   :  { %v1655_v54 = vmax.f32 %v1647_v49, 0.0  ;;  %v1659_v63 = vmax.f32 %v1651_v56, 0.0  ;;  %v1660_v3 = vmax.f32 %v1652_v60, 0.0  ;;  %v1661_v5 = vmax.f32 %v1653_v0, 0.0  ;;  %v2449_v0 = vld [vmem:[%s3790_s1 + $0x168] sm:$0xff] }
 0x87e   :  { %v3015_v62 = vpack.c.bf16 %v1657_v53, %v1656_v55  ;;  %2015 = vperm.xlu0 %3145, %v2445_v31   ;;  %v1672_v21 = vpop.permute.xlu1 %1671 }
 0x87f   :  { %v3011_v59 = vpack.c.bf16 %v1655_v54, %v1654_v32  ;;  %v3019_v1 = vpack.c.bf16 %v1659_v63, %v1658_v61  ;;  %v3023_v8 = vpack.c.bf16 %v1661_v5, %v1660_v3  ;;  %1959 = vperm.xlu1 %3143, %v2443_v30   ;;  %v2430_v63 = vld [vmem:[%s3790_s1 + $0x160] sm:$0xf] }
 0x881   :  { %3012 = vmatprep.subr.bf16.mxu0 %v3011_v59 }
 0x882   :  { %3014 = vmatpush3.bf16.msra.mxu0 %v3011_v59  ;;  %2019 = vperm.xlu0 %3145, %v2446_v12   ;;  %v1680_v46 = vpop.permute.xlu1 %1679 }
 0x883   :  { %3016 = vmatprep.subr.bf16.mxu0 %v3015_v62  ;;  %3144 = vset.pattern.permute.xlu1 %v3202_v2 }
 0x884   :  { %2007 = vperm.xlu1 %3144, %v2443_v30  }
 0x886   :  { %3018 = vmatpush3.bf16.msra.mxu0 %v3015_v62  ;;  %3150 = vset.pattern.permute.xlu0 %v3204_v11  ;;  %v1688_v55 = vpop.permute.xlu1 %1687 }
 0x887   :  { %3020 = vmatprep.subr.bf16.mxu0 %v3019_v1  ;;  %2043 = vperm.xlu0 %3150, %v2440_v23  }
 0x888   :  { %3146 = vset.pattern.permute.xlu1 %v3203_v4 }
 0x889   :  { %1969 = vperm.xlu1 %3146, %v2445_v31  }
 0x88a   :  { %3022 = vmatpush3.bf16.msra.mxu0 %v3019_v1 }
 0x88b   :  { %3024 = vmatprep.subr.bf16.mxu0 %v3023_v8  ;;  %2055 = vperm.xlu0 %3150, %v2443_v30  }
 0x88d   :  { %3147 = vset.pattern.permute.xlu1 %v3202_v2 }
 0x88e   :  { %3026 = vmatpush3.bf16.msra.mxu0 %v3023_v8  ;;  %2011 = vperm.xlu1 %3147, %v2444_v24  }
 0x88f   :  { %2063 = vperm.xlu0 %3150, %v2445_v31  }
 0x891   :  { %2822 = vmatmul.mubr.msk.f32.vlgmr.msra.gmra.mrb[32].mxu0 %vm167_vm0, %v2423_v9 }
 0x892   :  { %2824 = vmatprep.mubr.msk.f32.mxu0 %vm167_vm0, %v2424_v13  ;;  %3148 = vset.pattern.permute.xlu1 %v3203_v4 }
 0x893   :  { %2071 = vperm.xlu0 %3150, %v2447_v33   ;;  %1974 = vperm.xlu1 %3148, %v2446_v12  }
 0x895   :  { %2825 = vmatmul.mubr.msk.f32.gmra.mrb[34].mxu0 %vm167_vm0, %v2425_v16 }
 0x896   :  { %2827 = vmatprep.mubr.msk.f32.mxu0 %vm167_vm0, %v2426_v17 }
 0x897   :  { %3153 = vset.pattern.permute.xlu0 %v3208_v10  ;;  %1979 = vperm.xlu1 %3148, %v2447_v33  }
 0x899   :  { %2828 = vmatmul.mubr.msk.f32.gmra.mrb[36].mxu0 %vm167_vm0, %v2427_v18 }
 0x89a   :  { %2830 = vmatprep.mubr.msk.f32.mxu0 %vm167_vm0, %v2428_v19 }
 0x89b   :  { %3149 = vset.pattern.permute.xlu1 %v3202_v2 }
 0x89c   :  { %2023 = vperm.xlu1 %3149, %v2447_v33  }
 0x89d   :  { %2831 = vmatmul.mubr.msk.f32.gmra.mrb[38].mxu0 %vm167_vm0, %v2429_v20 }
 0x89e   :  { %2868 = vmatprep.mubr.msk.f32.mxu0 %vm167_vm0, %v2449_v0  ;;  %v2453_v0 = vld [vmem:[%s3790_s1 + $0x188] sm:$0xff] }
 0x8a0   :  { %3151 = vset.pattern.permute.xlu1 %v3204_v11  ;;  %v1684_v11 = vpop.permute.xlu0 %1683 }
 0x8a1   :  { %2047 = vperm.xlu1 %3151, %v2441_v25  }
 0x8a4   :  { %v1692_v52 = vpop.permute.xlu0 %1691 }
 0x8a5   :  { %2051 = vperm.xlu1 %3151, %v2442_v28  }
 0x8a9   :  { %2059 = vperm.xlu1 %3151, %v2444_v24  }
 0x8ad   :  { %2067 = vperm.xlu1 %3151, %v2446_v12  }
 0x8b1   :  { %3152 = vset.pattern.permute.xlu1 %v3208_v10 }
 0x8e3   :  { %v1834_v1 = vpop.permute.xlu1 %1833 }
 0x8e5   :  { %v1945_v18 = vpop.permute.xlu0 %1944 }
 0x8e8   :  { %v1950_v3 = vpop.permute.xlu1 %1949 }
 0x8ed   :  { %v1996_v5 = vpop.permute.xlu1 %1995 }
 0x8fa   :  { %v1955_v8 = vpop.permute.xlu1 %1954 }
 0x8fe   :  { %v1960_v17 = vpop.permute.xlu1 %1959 }
 0x903   :  { %v2008_v19 = vpop.permute.xlu1 %2007 }
 0x908   :  { %v1970_v25 = vpop.permute.xlu1 %1969 }
 0x90d   :  { %v2012_v31 = vpop.permute.xlu1 %2011 }
 0x964   :  { %v2823_v4 = vpop.f32.mrb[32].mxu0 }
 0x965   :  { %v1790_v38 = vadd.f32 %v2823_v4, %v1668_v36  ;;  %v1784_v27 = vpop.f32.mrb[33].mxu0 }
 0x966   :  { %v1785_v40 = vadd.f32 %v1784_v27, %v1664_v34 }
 0x967   :  { %v1824_v41 = vmax.f32 %v1790_v38, 0.0 }
 0x968   :  { %v1823_v42 = vmax.f32 %v1785_v40, 0.0  ;;  %v2826_v2 = vpop.f32.mrb[34].mxu0 }
 0x969   :  { %v1800_v43 = vadd.f32 %v2826_v2, %v1676_v37  ;;  %v1794_v44 = vpop.f32.mrb[35].mxu0  ;;  %v1975_v37 = vpop.permute.xlu1 %1974 }
 0x96a   :  { %v3028_v15 = vpack.c.bf16 %v1824_v41, %v1823_v42  ;;  %v1795_v45 = vadd.f32 %v1794_v44, %v1672_v21 }
 0x96b   :  { %v1826_v26 = vmax.f32 %v1800_v43, 0.0 }
 0x96c   :  { %v1825_v47 = vmax.f32 %v1795_v45, 0.0  ;;  %v2829_v10 = vpop.f32.mrb[36].mxu0  ;;  %3029 = vmatpush3.bf16.msra.mxu1 %v3028_v15 }
 0x96d   :  { %v1810_v48 = vadd.f32 %v2829_v10, %v1684_v11  ;;  %v1804_v49 = vpop.f32.mrb[37].mxu0  ;;  %3030 = vmatprep.subr.bf16.mxu1 %v3205_v6  ;;  %v1980_v42 = vpop.permute.xlu1 %1979 }
 0x96e   :  { %v3031_v32 = vpack.c.bf16 %v1826_v26, %v1825_v47  ;;  %v1805_v50 = vadd.f32 %v1804_v49, %v1680_v46 }
 0x96f   :  { %v1828_v51 = vmax.f32 %v1810_v48, 0.0 }
 0x970   :  { %v1827_v53 = vmax.f32 %v1805_v50, 0.0  ;;  %v2832_v54 = vpop.f32.mrb[38].mxu0  ;;  %3032 = vmatpush3.bf16.msra.mxu1 %v3031_v32 }
 0x971   :  { %v1820_v56 = vadd.f32 %v2832_v54, %v1692_v52  ;;  %v1814_v57 = vpop.f32.mrb[39].mxu0  ;;  %3033 = vmatprep.subr.bf16.mxu1 %v3205_v6  ;;  %v2024_v50 = vpop.permute.xlu1 %2023 }
 0x972   :  { %v3034_v58 = vpack.c.bf16 %v1828_v51, %v1827_v53  ;;  %v1815_v59 = vadd.f32 %v1814_v57, %v1688_v55 }
 0x973   :  { %v1830_v60 = vmax.f32 %v1820_v56, 0.0 }
 0x974   :  { %v1829_v61 = vmax.f32 %v1815_v59, 0.0  ;;  %3035 = vmatpush3.bf16.msra.mxu1 %v3034_v58 }
 0x975   :  { %3036 = vmatprep.subr.bf16.mxu1 %v3205_v6 }
 0x976   :  { %v3037_v62 = vpack.c.bf16 %v1830_v60, %v1829_v61  ;;  %v2450_v61 = vld [vmem:[%s3790_s1 + $0x170] sm:$0xff] }
 0x978   :  { %3038 = vmatpush3.bf16.msra.mxu1 %v3037_v62  ;;  %v2451_v62 = vld [vmem:[%s3790_s1 + $0x178] sm:$0xff] }
 0x979   :  { %3055 = vmatprep.subr.bf16.mxu1 %v3205_v6 }
 0x97b   :  { %2850 = vmatmul.mubr.msk.f32.vlgmr.msra.gmra.mrb[8].mxu1 %vm167_vm0, %v2430_v63  ;;  %v2452_v63 = vld [vmem:[%s3790_s1 + $0x180] sm:$0xff] }
 0x97c   :  { %2896 = vmatprep.mubr.msk.f32.mxu1 %vm3206_vm1, %v3207_v7  ;;  %v1965_v7 = vpop.permute.xlu0 %1964 }
 0x980   :  { %v2000_v30 = vpop.permute.xlu0 %1999 }
 0x984   :  { %v2004_v33 = vpop.permute.xlu0 %2003 }
 0xa4e   :  { %v1905_v9 = vpop.f32.mrb[8].mxu1 }
 0xa4f   :  { %v1906_v13 = vadd.f32 %v1905_v9, %v1834_v1  ;;  %v2851_v16 = vpop.f32.mrb[9].mxu1  ;;  %v2454_v1 = vld [vmem:[%s3790_s1 + $0x190] sm:$0xff] }
 0xa51   :  { %3170 = vtanh.f32 %v1906_v13  ;;  %v1914_v36 = vrot.slane %v1906_v13, 2  ;;  %v2048_v13 = vpop.permute.xlu1 %2047 }
 0xa5b   :  { %v3171_v20 = vpop.eup %3170 }
 0xa5c   :  { %v1910_v22 = vmul.f32 1.442695, %v3171_v20  ;;  %v1917_v23 = vadd.f32 %v3171_v20, %v3640_v29  ;;  %v1919_v24 = vrot.slane %v3171_v20, 1  ;;  %v2016_v29 = vpop.permute.xlu0 %2015 }
 0xa5e   :  { %3172 = vpow2.f32 %v1910_v22  ;;  %v3730_v28 = vadd.f32 %v1919_v24, %v1917_v23 }
 0xa60   :  { %v2020_v32 = vpop.permute.xlu0 %2019 }
 0xa64   :  { %v2044_v9 = vpop.permute.xlu0 %2043 }
 0xa68   :  { %v3173_v12 = vpop.eup %3172  ;;  %v2056_v16 = vpop.permute.xlu0 %2055 }
 0xa69   :  { %v1912_v34 = vmul.f32 %v3173_v12, %v3553_v35 }
 0xa6b   :  { %v1916_v4 = vadd.f32 %v1914_v36, %v1912_v34 }
 0xa6d   :  { %v1985_v21 = vrot.slane %v1916_v4, %v3271_v14  ;;  %2306 = vst.msk [vmem:[#allocation2] sm:$0x1] %vm2305_vm2, %v1916_v4 }
 0xa6f   :  { %v1988_v38 = vmul.f32 %v1985_v21, %v1955_v8  ;;  %v1989_v27 = vmul.f32 %v1985_v21, %v1960_v17  ;;  %v1986_v40 = vmul.f32 %v1985_v21, %v1945_v18  ;;  %v1990_v41 = vmul.f32 %v1985_v21, %v1965_v7  ;;  %v2448_v8 = vld [vmem:[%s3791_s2 + $0x140] sm:$0xf]  ;;  %v2052_v18 = vpop.permute.xlu1 %2051 }
 0xa70   :  { %v1991_v2 = vmul.f32 %v1985_v21, %v1970_v25  ;;  %v1987_v43 = vmul.f32 %v1985_v21, %v1950_v3  ;;  %v1992_v26 = vmul.f32 %v1985_v21, %v1975_v37  ;;  %v1993_v47 = vmul.f32 %v1985_v21, %v1980_v42  ;;  %v2455_v3 = vld [vmem:[%s3790_s1 + $0x198] sm:$0xff]  ;;  %2213 = vperm.xlu1 %3152, %v2448_v8  }
 0xa71   :  { %v2026_v44 = vadd.f32 %v1996_v5, %v1986_v40  ;;  %v2029_v11 = vadd.f32 %v2008_v19, %v1989_v27  ;;  %v2028_v15 = vadd.f32 %v2004_v33, %v1988_v38  ;;  %v2030_v46 = vadd.f32 %v2012_v31, %v1990_v41  ;;  %v2456_v5 = vld [vmem:[%s3790_s1 + $0x1a0] sm:$0xff]  ;;  %v2064_v31 = vpop.permute.xlu0 %2063 }
 0xa72   :  { %v2027_v35 = vadd.f32 %v2000_v30, %v1987_v43  ;;  %v2031_v49 = vadd.f32 %v2016_v29, %v1991_v2  ;;  %v2032_v52 = vadd.f32 %v2020_v32, %v1992_v26  ;;  %v2033_v56 = vadd.f32 %v2024_v50, %v1993_v47  ;;  %v2457_v47 = vld [vmem:[%s3790_s1 + $0x1a8] sm:$0xf]  ;;  %s2315_s1 = sshll.u32 %s3209_s9, 4  ;;  %s2316_s1 = int_to_ptr.vmem [resolvable:$true] %s2315_s1 }
 0xa73   :  { %v2034_v45 = vmax.f32 %v2026_v44, 0.0  ;;  %v2037_v10 = vmax.f32 %v2029_v11, 0.0  ;;  %v2036_v48 = vmax.f32 %v2028_v15, 0.0  ;;  %v2038_v53 = vmax.f32 %v2030_v46, 0.0  ;;  %v2060_v34 = vpop.permute.xlu1 %2059  ;;  %s3178_s10 = scalar_lea.vmem %s2316_s1, 64  ;;  %p3183_p1 = scmp.lt.s32.totalorder %s2316_s1, %s2316_s1 }
 0xa74   :  { %v2035_v14 = vmax.f32 %v2027_v35, 0.0  ;;  %v2039_v55 = vmax.f32 %v2031_v49, 0.0  ;;  %v2040_v58 = vmax.f32 %v2032_v52, 0.0  ;;  %v2041_v59 = vmax.f32 %v2033_v56, 0.0  ;;  %p3179_p0 = scmp.ne.s32.totalorder %s2316_s1, %s3178_s10  ;;  %p3184_p2 = scmp.lt.s32.totalorder %s3178_s10, %s3178_s10 }
 0xa75   :  { %v3043_v54 = vpack.c.bf16 %v2037_v10, %v2036_v48  ;;  %v2072_v41 = vpop.permute.xlu0 %2071 }
 0xa76   :  { %v3039_v51 = vpack.c.bf16 %v2035_v14, %v2034_v45  ;;  %v3047_v57 = vpack.c.bf16 %v2039_v55, %v2038_v53  ;;  %v3051_v60 = vpack.c.bf16 %v2041_v59, %v2040_v58  ;;  %p3185_p3 = por %p3184_p2, %p3183_p1 }
 0xa77   :  { %v2068_v43 = vpop.permute.xlu1 %2067 }
 0xa78   :  { %3040 = vmatprep.subr.bf16.mxu0 %v3039_v51  ;;  %p3186_p4 = pnand %p3185_p3, %p3179_p0 }
 0xa79   :  { %3042 = vmatpush3.bf16.msra.mxu0 %v3039_v51 }
 0xa7a   :  { %3044 = vmatprep.subr.bf16.mxu0 %v3043_v54 }
 0xa7d   :  { %3046 = vmatpush3.bf16.msra.mxu0 %v3043_v54 }
 0xa7e   :  { %3048 = vmatprep.subr.bf16.mxu0 %v3047_v57 }
 0xa81   :  { %3050 = vmatpush3.bf16.msra.mxu0 %v3047_v57 }
 0xa82   :  { %3052 = vmatprep.subr.bf16.mxu0 %v3051_v60 }
 0xa85   :  { %3054 = vmatpush3.bf16.msra.mxu0 %v3051_v60 }
 0xa88   :  { %2869 = vmatmul.mubr.msk.f32.vlgmr.msra.gmra.mrb[40].mxu0 %vm167_vm0, %v2450_v61 }
 0xa89   :  { %2871 = vmatprep.mubr.msk.f32.mxu0 %vm167_vm0, %v2451_v62 }
 0xa8c   :  { %2872 = vmatmul.mubr.msk.f32.gmra.mrb[42].mxu0 %vm167_vm0, %v2452_v63 }
 0xa8d   :  { %2874 = vmatprep.mubr.msk.f32.mxu0 %vm167_vm0, %v2453_v0 }
 0xa90   :  { %2875 = vmatmul.mubr.msk.f32.gmra.mrb[44].mxu0 %vm167_vm0, %v2454_v1 }
 0xa91   :  { %2877 = vmatprep.mubr.msk.f32.mxu0 %vm167_vm0, %v2455_v3 }
 0xa94   :  { %2878 = vmatmul.mubr.msk.f32.gmra.mrb[46].mxu0 %vm167_vm0, %v2456_v5 }
 0xaef   :  { %v2214_v10 = vpop.permute.xlu1 %2213 }
 0xb5b   :  { %v2870_v17 = vpop.f32.mrb[40].mxu0 }
 0xb5c   :  { %v2170_v19 = vadd.f32 %v2870_v17, %v2048_v13  ;;  %v2164_v20 = vpop.f32.mrb[41].mxu0 }
 0xb5d   :  { %v2165_v22 = vadd.f32 %v2164_v20, %v2044_v9 }
 0xb5e   :  { %v2204_v7 = vmax.f32 %v2170_v19, 0.0 }
 0xb5f   :  { %v2203_v23 = vmax.f32 %v2165_v22, 0.0  ;;  %v2873_v24 = vpop.f32.mrb[42].mxu0 }
 0xb60   :  { %v2180_v25 = vadd.f32 %v2873_v24, %v2056_v16  ;;  %v2174_v30 = vpop.f32.mrb[43].mxu0 }
 0xb61   :  { %v3056_v12 = vpack.c.bf16 %v2204_v7, %v2203_v23  ;;  %v2175_v33 = vadd.f32 %v2174_v30, %v2052_v18 }
 0xb62   :  { %v2206_v36 = vmax.f32 %v2180_v25, 0.0 }
 0xb63   :  { %v2205_v37 = vmax.f32 %v2175_v33, 0.0  ;;  %v2876_v4 = vpop.f32.mrb[44].mxu0  ;;  %3057 = vmatpush3.bf16.msra.mxu1 %v3056_v12 }
 0xb64   :  { %v2190_v21 = vadd.f32 %v2876_v4, %v2064_v31  ;;  %v2184_v29 = vpop.f32.mrb[45].mxu0  ;;  %3058 = vmatprep.subr.bf16.mxu1 %v3205_v6 }
 0xb65   :  { %v3059_v38 = vpack.c.bf16 %v2206_v36, %v2205_v37  ;;  %v2185_v27 = vadd.f32 %v2184_v29, %v2060_v34 }
 0xb66   :  { %v2208_v40 = vmax.f32 %v2190_v21, 0.0 }
 0xb67   :  { %v2207_v42 = vmax.f32 %v2185_v27, 0.0  ;;  %v2879_v2 = vpop.f32.mrb[46].mxu0  ;;  %3060 = vmatpush3.bf16.msra.mxu1 %v3059_v38 }
 0xb68   :  { %v2200_v44 = vadd.f32 %v2879_v2, %v2072_v41  ;;  %v2194_v11 = vpop.f32.mrb[47].mxu0  ;;  %3061 = vmatprep.subr.bf16.mxu1 %v3205_v6 }
 0xb69   :  { %v3062_v15 = vpack.c.bf16 %v2208_v40, %v2207_v42  ;;  %v2195_v35 = vadd.f32 %v2194_v11, %v2068_v43 }
 0xb6a   :  { %v2210_v45 = vmax.f32 %v2200_v44, 0.0 }
 0xb6b   :  { %v2209_v46 = vmax.f32 %v2195_v35, 0.0  ;;  %3063 = vmatpush3.bf16.msra.mxu1 %v3062_v15 }
 0xb6c   :  { %3064 = vmatprep.subr.bf16.mxu1 %v3205_v6 }
 0xb6d   :  { %v3065_v26 = vpack.c.bf16 %v2210_v45, %v2209_v46 }
 0xb6f   :  { %3066 = vmatpush3.bf16.msra.mxu1 %v3065_v26 }
 0xb72   :  { %2897 = vmatmul.mubr.msk.f32.vlgmr.msra.gmra.mrb[10].mxu1 %vm167_vm0, %v2457_v47 }
 0xc45   :  { %v2285_v14 = vpop.f32.mrb[10].mxu1 }
 0xc46   :  { %v2286_v48 = vadd.f32 %v2285_v14, %v2214_v10  ;;  %v2898_v49 = vpop.f32.mrb[11].mxu1 }
 0xc48   :  { %3174 = vtanh.f32 %v2286_v48  ;;  %v2297_v56 = vrot.slane %v2286_v48, 3 }
 0xc52   :  { %v3175_v32 = vpop.eup %3174 }
 0xc53   :  { %v2290_v50 = vmul.f32 1.442695, %v3175_v32  ;;  %v2300_v51 = vadd.f32 %v3175_v32, %v3730_v28  ;;  %v2302_v52 = vrot.slane %v3175_v32, 1 }
 0xc55   :  { %3176 = vpow2.f32 %v2290_v50  ;;  %v2304_v6 = vadd.f32 %v2302_v52, %v2300_v51 }
 0xc57   :  { %2308 = vst.msk [vmem:[#allocation2 + $0x2] sm:$0x1] %vm2305_vm2, %v2304_v6 }
 0xc5f   :  { %v3177_v53 = vpop.eup %3176 }
 0xc60   :  { %v2293_v54 = vrot.slane %v3177_v53, 1 }
 0xc62   :  { %v2295_v55 = vmul.f32 %v2293_v54, %v3643_v39 }
 0xc64   :  { %v2299_v57 = vadd.f32 %v2297_v56, %v2295_v55 }
 0xc66   :  { %2307 = vst.msk [vmem:[#allocation2 + $0x1] sm:$0x1] %vm2305_vm2, %v2299_v57 }
 0xc67   :  { %3189 = shalt.err (!%p3186_p4)
}
 0xc68   :  { %s3190_s13 = scalar_lea.hbm %s3792_s3, 64 }
 0xc69   :  { %p3191_p5 = scmp.ne.s32.totalorder %s3792_s3, %s3190_s13  ;;  %p3194_p6 = scmp.lt.u32.totalorder %s3190_s13, %s3792_s3 }
 0xc6b   :  { %p3196_p7 = pnand %p3194_p6, %p3191_p5 }
 0xc6d   :  { %3199 = shalt.err (!%p3196_p7)
}
 0xc6e   :  { %2318 = dma.vmem_to_hbm [thread:$0]  %s2316_s1, 64, %s3792_s3, [#allocation3]  }
 0xc6f   :  { %3200 = dma.done.wait [#allocation3], 64  }
 0xc70   :  { %3201 = vsyncadd [#allocation3], 4294967232 }
 0xc71   :  { %2322 = vsyncpa [#allocation3], 1 }

</bundles_post_ra>
